<compile_context>
chip_gen: v5e
topology: v5e:2x2
jax: 0.10.0
libtpu: 0.0.40
codegen_flags: <defaults>
</compile_context>

<pallas_src>
import jax
import jax.numpy as jnp
from jax import lax
from jax.experimental import pallas as pl
from jax.experimental.pallas import tpu as pltpu


# --------------------------------------------------------------------------
# Wrapper-side parameter packing (collapses many tiny DMAs into two slabs)
# --------------------------------------------------------------------------
def _pad_to(n, m):
    return ((n + m - 1) // m) * m


def _pack_weight_slab(mats):
    """Row-stack 2-D matrices into one bf16 slab; returns (slab, [(row_off, rows, cols)])."""
    cmax = max(int(m.shape[1]) for m in mats)
    blocks, metas, off = [], [], 0
    for m in mats:
        r, c = int(m.shape[0]), int(m.shape[1])
        rp = _pad_to(r, 16)                      # bf16 packs 16 rows per vreg
        blocks.append(jnp.zeros((rp, cmax), jnp.float32).at[:r, :c].set(m))
        metas.append((off, r, c))
        off += rp
    return jnp.concatenate(blocks, axis=0).astype(jnp.bfloat16), metas


def _pack_vector_slab(vecs):
    """Stack 1-D row params into one f32 (rows, cmax) slab; returns (slab, [(row, width)])."""
    cmax = max(int(v.shape[0]) for v in vecs)
    rows = _pad_to(len(vecs), 8)
    slab = jnp.zeros((rows, cmax), jnp.float32)
    metas = []
    for i, v in enumerate(vecs):
        w = int(v.shape[0])
        slab = slab.at[i, :w].set(v)
        metas.append((i, w))
    return slab, metas


# --------------------------------------------------------------------------
# Fused SAGEConvolutions kernel (whole block in one pallas_call)
# --------------------------------------------------------------------------
def _make_sage_block_kernel(B, N, Cin, H, C3, with_lin, wmeta, vmeta):
    BN = B * N
    inv_cnt = 1.0 / float(BN)        # BatchNorm 1/(B*N) as a Python constant (no runtime div)

    def kernel(x_ref, adj_ref, w_ref, v_ref, o_ref):
        def wmat(i):                 # bf16 weight block via free static ref slice
            off, r, c = wmeta[i]
            return w_ref[off:off + r, 0:c]

        def vrow(i):                 # f32 (1, c) row parameter
            row, c = vmeta[i]
            return v_ref[row:row + 1, 0:c]

        adj = adj_ref[...]                                               # (B, N, N) bf16, 0/1
        deg = jnp.sum(adj, axis=-1, keepdims=True, dtype=jnp.float32)    # exact in f32
        inv_deg = 1.0 / jnp.maximum(deg, 1.0)                            # (B, N, 1) f32

        def sage(h_bf, i_rel, i_root, i_b):
            # h_bf: (BN, C) bf16 -> (BN, C_out_layer) f32; two dots (no lane-dim K-merge)
            C = h_bf.shape[-1]
            agg = jnp.einsum("bij,bjc->bic", adj, h_bf.reshape(B, N, C),
                             preferred_element_type=jnp.float32)          # (B, N, C) f32
            agg = (agg * inv_deg).reshape(BN, C).astype(jnp.bfloat16)
            return (jnp.dot(agg, wmat(i_rel), preferred_element_type=jnp.float32)
                    + jnp.dot(h_bf, wmat(i_root), preferred_element_type=jnp.float32)
                    + vrow(i_b))

        def relu_bn(h, i_g, i_be):
            # training-mode BatchNorm1d over the full (BN, C) slab, f32, centered variance
            h = jnp.maximum(h, 0.0)
            mean = jnp.sum(h, axis=0, keepdims=True) * inv_cnt
            d = h - mean
            var = jnp.sum(d * d, axis=0, keepdims=True) * inv_cnt
            return d * (lax.rsqrt(var + 1e-5) * vrow(i_g)) + vrow(i_be)

        x0 = x_ref[...].reshape(BN, Cin)                                  # (BN, Cin) bf16
        x1 = relu_bn(sage(x0, 0, 1, 0), 1, 2)                             # (BN, H)  f32
        x2 = relu_bn(sage(x1.astype(jnp.bfloat16), 2, 3, 3), 4, 5)        # (BN, H)  f32
        x3 = sage(x2.astype(jnp.bfloat16), 4, 5, 6)                       # (BN, C3) f32

        if with_lin:
            # lin([x1|x2|x3]) == x1 @ Wl[:H] + x2 @ Wl[H:2H] + x3 @ Wl[2H:] + bl
            o_ref[...] = (jnp.dot(x1.astype(jnp.bfloat16), wmat(6),
                                  preferred_element_type=jnp.float32)
                          + jnp.dot(x2.astype(jnp.bfloat16), wmat(7),
                                    preferred_element_type=jnp.float32)
                          + jnp.dot(x3.astype(jnp.bfloat16), wmat(8),
                                    preferred_element_type=jnp.float32)
                          + vrow(7))
        else:
            # concat-free: write each branch into its static lane slice of the output
            o_ref[:, 0:H] = x1
            o_ref[:, H:2 * H] = x2
            o_ref[:, 2 * H:2 * H + C3] = x3

    return kernel


def sage_convolutions_forward(params, x, adj):
    B, N, Cin = x.shape
    BN = B * N
    with_lin = "lin" in params

    c1, c2, c3 = params["conv1"], params["conv2"], params["conv3"]
    H = int(c1["w_rel"].shape[1])
    C3 = int(c3["w_rel"].shape[1])

    wmats = [c1["w_rel"], c1["w_root"], c2["w_rel"], c2["w_root"],
             c3["w_rel"], c3["w_root"]]
    vrows = [c1["b"], params["bn1"][0], params["bn1"][1],
             c2["b"], params["bn2"][0], params["bn2"][1],
             c3["b"]]
    if with_lin:
        wl, bl = params["lin"]
        Cout = int(wl.shape[1])
        # pre-split the concat->linear weight so the kernel never concatenates
        wmats += [wl[:H], wl[H:2 * H], wl[2 * H:]]
        vrows += [bl]
    else:
        Cout = 2 * H + C3

    wslab, wmeta = _pack_weight_slab(wmats)
    vslab, vmeta = _pack_vector_slab(vrows)

    # bf16 matmul operands (adj is 0/1 -> exact); accumulation stays f32 inside the kernel
    x_bf = x.astype(jnp.bfloat16)
    adj_bf = adj.astype(jnp.bfloat16)

    # VMEM budget from the actual shapes (single-buffered inputs + f32 activation headroom)
    cbig = max(Cin, H, C3, Cout)
    est = (adj_bf.size * 2 + x_bf.size * 2 + wslab.size * 2 + vslab.size * 4
           + BN * Cout * 4 + 16 * BN * cbig * 4)
    vmem_limit = int(min(100 * 2 ** 20, max(16 * 2 ** 20, 4 * est)))

    vmem = pltpu.MemorySpace.VMEM
    out2d = pl.pallas_call(
        _make_sage_block_kernel(B, N, Cin, H, C3, with_lin, wmeta, vmeta),
        out_shape=jax.ShapeDtypeStruct((BN, Cout), jnp.float32),   # lane-dense 2-D output
        in_specs=[pl.BlockSpec(memory_space=vmem)] * 4,
        out_specs=pl.BlockSpec(memory_space=vmem),
        compiler_params=pltpu.CompilerParams(vmem_limit_bytes=vmem_limit),
    )(x_bf, adj_bf, wslab, vslab)
    return out2d.reshape(B, N, Cout)


# --------------------------------------------------------------------------
# Deterministic parameter init (W_rel / W_root kept separate; weights stored [in, out])
# --------------------------------------------------------------------------
def init_sage_convolutions(key, in_ch, hidden, out_ch, lin=True):
    def dense_sage(k, cin, cout):
        k1, k2, k3 = jax.random.split(k, 3)
        return {
            "w_rel": 0.1 * jax.random.normal(k1, (cin, cout), jnp.float32),
            "w_root": 0.1 * jax.random.normal(k2, (cin, cout), jnp.float32),
            "b": 0.1 * jax.random.normal(k3, (cout,), jnp.float32),
        }

    ks = jax.random.split(key, 5)
    p = {
        "conv1": dense_sage(ks[0], in_ch, hidden),
        "bn1": (jnp.ones((hidden,), jnp.float32), jnp.zeros((hidden,), jnp.float32)),
        "conv2": dense_sage(ks[1], hidden, hidden),
        "bn2": (jnp.ones((hidden,), jnp.float32), jnp.zeros((hidden,), jnp.float32)),
        "conv3": dense_sage(ks[2], hidden, out_ch),
    }
    if lin:  # Linear((NUM_SAGE_LAYERS - 1) * hidden + out, out)
        p["lin"] = (0.1 * jax.random.normal(ks[3], (2 * hidden + out_ch, out_ch), jnp.float32),
                    0.1 * jax.random.normal(ks[4], (out_ch,), jnp.float32))
    return p


if __name__ == "__main__":
    B, N = 2, 16
    in_ch, hidden, out_ch = 8, 16, 16

    key = jax.random.PRNGKey(0)
    kx, ka, kp1, kp2 = jax.random.split(key, 4)

    x = jax.random.normal(kx, (B, N, in_ch), jnp.float32)
    a = jax.random.uniform(ka, (B, N, N), jnp.float32)
    adj = ((a + jnp.swapaxes(a, 1, 2)) * 0.5 > 0.5).astype(jnp.float32)

    params_lin = init_sage_convolutions(kp1, in_ch, hidden, out_ch, lin=True)
    params_nolin = init_sage_convolutions(kp2, in_ch, hidden, out_ch, lin=False)

    fwd = jax.jit(lambda xi, ai: (sage_convolutions_forward(params_lin, xi, ai),
                                  sage_convolutions_forward(params_nolin, xi, ai)))
    y_lin, y_cat = fwd(x, adj)
    jax.block_until_ready((y_lin, y_cat))

    assert y_lin.shape == (B, N, out_ch)
    assert y_cat.shape == (B, N, 2 * hidden + out_ch)
    assert bool(jnp.all(jnp.isfinite(y_lin))) and bool(jnp.all(jnp.isfinite(y_cat)))
    print("KERNEL_OK")
</pallas_src>

<mosaic_0001>
module attributes {stable_mosaic.version = 11 : i64} {
  func.func @kernel(%arg0: memref<2x16x8xbf16, #tpu.memory_space<vmem>>, %arg1: memref<2x16x16xbf16, #tpu.memory_space<vmem>>, %arg2: memref<96x16xbf16, #tpu.memory_space<vmem>>, %arg3: memref<8x16xf32, #tpu.memory_space<vmem>>, %arg4: memref<32x48xf32, #tpu.memory_space<vmem>>) attributes {dimension_semantics = [], scalar_prefetch = 0 : i64, scratch_operands = 0 : i64, tpu.core_type = #tpu.core_type<tc>} {
    %c0 = arith.constant 0 : index
    %c0_0 = arith.constant 0 : index
    %c0_1 = arith.constant 0 : index
    %0 = vector.load %arg1[%c0, %c0_0, %c0_1] : memref<2x16x16xbf16, #tpu.memory_space<vmem>>, vector<2x16x16xbf16>
    %1 = arith.extf %0 : vector<2x16x16xbf16> to vector<2x16x16xf32>
    %cst = arith.constant dense<0.000000e+00> : vector<2x16xf32>
    %2 = vector.multi_reduction <add>, %1, %cst [2] : vector<2x16x16xf32> to vector<2x16xf32>
    %3 = vector.shape_cast %2 : vector<2x16xf32> to vector<2x16x1xf32>
    %cst_2 = arith.constant 1.000000e+00 : f32
    %4 = vector.broadcast %cst_2 : f32 to vector<2x16x1xf32>
    %5 = arith.maximumf %3, %4 : vector<2x16x1xf32>
    %cst_3 = arith.constant 1.000000e+00 : f32
    %6 = vector.broadcast %cst_3 : f32 to vector<2x16x1xf32>
    %7 = arith.divf %6, %5 : vector<2x16x1xf32>
    %c0_4 = arith.constant 0 : index
    %c0_5 = arith.constant 0 : index
    %c0_6 = arith.constant 0 : index
    %8 = vector.load %arg0[%c0_4, %c0_5, %c0_6] : memref<2x16x8xbf16, #tpu.memory_space<vmem>>, vector<2x16x8xbf16>
    %9 = vector.shape_cast %8 : vector<2x16x8xbf16> to vector<32x8xbf16>
    %10 = vector.shape_cast %9 : vector<32x8xbf16> to vector<2x16x8xbf16>
    "tpu.trace_start"() <{level = 10 : i32, message = "bij,bjc->bic"}> : () -> ()
    %cst_7 = arith.constant dense<0.000000e+00> : vector<2x16x8xf32>
    %11 = tpu.matmul %0, %10, %cst_7 {dimension_numbers = #tpu.dot_dimension_numbers<[2], [1], [1], [2], [0, 0, 0, 1, 1, 2], [0], [0]>} : vector<2x16x16xbf16>, vector<2x16x8xbf16>, vector<2x16x8xf32> -> vector<2x16x8xf32>
    "tpu.trace_stop"() : () -> ()
    %12 = vector.broadcast %7 : vector<2x16x1xf32> to vector<2x16x8xf32>
    %13 = arith.mulf %11, %12 : vector<2x16x8xf32>
    %14 = vector.shape_cast %13 : vector<2x16x8xf32> to vector<32x8xf32>
    %15 = arith.truncf %14 : vector<32x8xf32> to vector<32x8xbf16>
    %c0_8 = arith.constant 0 : index
    %c0_9 = arith.constant 0 : index
    %16 = vector.load %arg2[%c0_8, %c0_9] : memref<96x16xbf16, #tpu.memory_space<vmem>>, vector<8x16xbf16>
    %cst_10 = arith.constant dense<0.000000e+00> : vector<32x16xf32>
    %17 = tpu.matmul %15, %16, %cst_10 {dimension_numbers = #tpu.dot_dimension_numbers<[1], [0], [0], [1], [0, 0, 1, 1], [], []>} : vector<32x8xbf16>, vector<8x16xbf16>, vector<32x16xf32> -> vector<32x16xf32>
    %c16 = arith.constant 16 : index
    %c0_11 = arith.constant 0 : index
    %18 = vector.load %arg2[%c16, %c0_11] : memref<96x16xbf16, #tpu.memory_space<vmem>>, vector<8x16xbf16>
    %cst_12 = arith.constant dense<0.000000e+00> : vector<32x16xf32>
    %19 = tpu.matmul %9, %18, %cst_12 {dimension_numbers = #tpu.dot_dimension_numbers<[1], [0], [0], [1], [0, 0, 1, 1], [], []>} : vector<32x8xbf16>, vector<8x16xbf16>, vector<32x16xf32> -> vector<32x16xf32>
    %20 = arith.addf %17, %19 : vector<32x16xf32>
    %c0_13 = arith.constant 0 : index
    %c0_14 = arith.constant 0 : index
    %21 = vector.load %arg3[%c0_13, %c0_14] : memref<8x16xf32, #tpu.memory_space<vmem>>, vector<1x16xf32>
    %22 = vector.broadcast %21 : vector<1x16xf32> to vector<32x16xf32>
    %23 = arith.addf %20, %22 : vector<32x16xf32>
    %cst_15 = arith.constant 0.000000e+00 : f32
    %24 = vector.broadcast %cst_15 : f32 to vector<32x16xf32>
    %25 = arith.maximumf %23, %24 : vector<32x16xf32>
    %cst_16 = arith.constant dense<0.000000e+00> : vector<16xf32>
    %26 = vector.multi_reduction <add>, %25, %cst_16 [0] : vector<32x16xf32> to vector<16xf32>
    %27 = vector.shape_cast %26 : vector<16xf32> to vector<1x16xf32>
    %cst_17 = arith.constant 3.125000e-02 : f32
    %28 = vector.broadcast %cst_17 : f32 to vector<1x16xf32>
    %29 = arith.mulf %27, %28 : vector<1x16xf32>
    %30 = vector.broadcast %29 : vector<1x16xf32> to vector<32x16xf32>
    %31 = arith.subf %25, %30 : vector<32x16xf32>
    %32 = arith.mulf %31, %31 : vector<32x16xf32>
    %cst_18 = arith.constant dense<0.000000e+00> : vector<16xf32>
    %33 = vector.multi_reduction <add>, %32, %cst_18 [0] : vector<32x16xf32> to vector<16xf32>
    %34 = vector.shape_cast %33 : vector<16xf32> to vector<1x16xf32>
    %cst_19 = arith.constant 3.125000e-02 : f32
    %35 = vector.broadcast %cst_19 : f32 to vector<1x16xf32>
    %36 = arith.mulf %34, %35 : vector<1x16xf32>
    %cst_20 = arith.constant 9.99999974E-6 : f32
    %37 = vector.broadcast %cst_20 : f32 to vector<1x16xf32>
    %38 = arith.addf %36, %37 : vector<1x16xf32>
    %39 = math.rsqrt %38 : vector<1x16xf32>
    %c1 = arith.constant 1 : index
    %c0_21 = arith.constant 0 : index
    %40 = vector.load %arg3[%c1, %c0_21] : memref<8x16xf32, #tpu.memory_space<vmem>>, vector<1x16xf32>
    %41 = arith.mulf %39, %40 : vector<1x16xf32>
    %42 = vector.broadcast %41 : vector<1x16xf32> to vector<32x16xf32>
    %43 = arith.mulf %31, %42 : vector<32x16xf32>
    %c2 = arith.constant 2 : index
    %c0_22 = arith.constant 0 : index
    %44 = vector.load %arg3[%c2, %c0_22] : memref<8x16xf32, #tpu.memory_space<vmem>>, vector<1x16xf32>
    %45 = vector.broadcast %44 : vector<1x16xf32> to vector<32x16xf32>
    %46 = arith.addf %43, %45 : vector<32x16xf32>
    %47 = arith.truncf %46 : vector<32x16xf32> to vector<32x16xbf16>
    %48 = vector.shape_cast %47 : vector<32x16xbf16> to vector<2x16x16xbf16>
    "tpu.trace_start"() <{level = 10 : i32, message = "bij,bjc->bic"}> : () -> ()
    %cst_23 = arith.constant dense<0.000000e+00> : vector<2x16x16xf32>
    %49 = tpu.matmul %0, %48, %cst_23 {dimension_numbers = #tpu.dot_dimension_numbers<[2], [1], [1], [2], [0, 0, 0, 1, 1, 2], [0], [0]>} : vector<2x16x16xbf16>, vector<2x16x16xbf16>, vector<2x16x16xf32> -> vector<2x16x16xf32>
    "tpu.trace_stop"() : () -> ()
    %50 = vector.broadcast %7 : vector<2x16x1xf32> to vector<2x16x16xf32>
    %51 = arith.mulf %49, %50 : vector<2x16x16xf32>
    %52 = vector.shape_cast %51 : vector<2x16x16xf32> to vector<32x16xf32>
    %53 = arith.truncf %52 : vector<32x16xf32> to vector<32x16xbf16>
    %c32 = arith.constant 32 : index
    %c0_24 = arith.constant 0 : index
    %54 = vector.load %arg2[%c32, %c0_24] : memref<96x16xbf16, #tpu.memory_space<vmem>>, vector<16x16xbf16>
    %cst_25 = arith.constant dense<0.000000e+00> : vector<32x16xf32>
    %55 = tpu.matmul %53, %54, %cst_25 {dimension_numbers = #tpu.dot_dimension_numbers<[1], [0], [0], [1], [0, 0, 1, 1], [], []>} : vector<32x16xbf16>, vector<16x16xbf16>, vector<32x16xf32> -> vector<32x16xf32>
    %c48 = arith.constant 48 : index
    %c0_26 = arith.constant 0 : index
    %56 = vector.load %arg2[%c48, %c0_26] : memref<96x16xbf16, #tpu.memory_space<vmem>>, vector<16x16xbf16>
    %cst_27 = arith.constant dense<0.000000e+00> : vector<32x16xf32>
    %57 = tpu.matmul %47, %56, %cst_27 {dimension_numbers = #tpu.dot_dimension_numbers<[1], [0], [0], [1], [0, 0, 1, 1], [], []>} : vector<32x16xbf16>, vector<16x16xbf16>, vector<32x16xf32> -> vector<32x16xf32>
    %58 = arith.addf %55, %57 : vector<32x16xf32>
    %c3 = arith.constant 3 : index
    %c0_28 = arith.constant 0 : index
    %59 = vector.load %arg3[%c3, %c0_28] : memref<8x16xf32, #tpu.memory_space<vmem>>, vector<1x16xf32>
    %60 = vector.broadcast %59 : vector<1x16xf32> to vector<32x16xf32>
    %61 = arith.addf %58, %60 : vector<32x16xf32>
    %cst_29 = arith.constant 0.000000e+00 : f32
    %62 = vector.broadcast %cst_29 : f32 to vector<32x16xf32>
    %63 = arith.maximumf %61, %62 : vector<32x16xf32>
    %cst_30 = arith.constant dense<0.000000e+00> : vector<16xf32>
    %64 = vector.multi_reduction <add>, %63, %cst_30 [0] : vector<32x16xf32> to vector<16xf32>
    %65 = vector.shape_cast %64 : vector<16xf32> to vector<1x16xf32>
    %cst_31 = arith.constant 3.125000e-02 : f32
    %66 = vector.broadcast %cst_31 : f32 to vector<1x16xf32>
    %67 = arith.mulf %65, %66 : vector<1x16xf32>
    %68 = vector.broadcast %67 : vector<1x16xf32> to vector<32x16xf32>
    %69 = arith.subf %63, %68 : vector<32x16xf32>
    %70 = arith.mulf %69, %69 : vector<32x16xf32>
    %cst_32 = arith.constant dense<0.000000e+00> : vector<16xf32>
    %71 = vector.multi_reduction <add>, %70, %cst_32 [0] : vector<32x16xf32> to vector<16xf32>
    %72 = vector.shape_cast %71 : vector<16xf32> to vector<1x16xf32>
    %cst_33 = arith.constant 3.125000e-02 : f32
    %73 = vector.broadcast %cst_33 : f32 to vector<1x16xf32>
    %74 = arith.mulf %72, %73 : vector<1x16xf32>
    %cst_34 = arith.constant 9.99999974E-6 : f32
    %75 = vector.broadcast %cst_34 : f32 to vector<1x16xf32>
    %76 = arith.addf %74, %75 : vector<1x16xf32>
    %77 = math.rsqrt %76 : vector<1x16xf32>
    %c4 = arith.constant 4 : index
    %c0_35 = arith.constant 0 : index
    %78 = vector.load %arg3[%c4, %c0_35] : memref<8x16xf32, #tpu.memory_space<vmem>>, vector<1x16xf32>
    %79 = arith.mulf %77, %78 : vector<1x16xf32>
    %80 = vector.broadcast %79 : vector<1x16xf32> to vector<32x16xf32>
    %81 = arith.mulf %69, %80 : vector<32x16xf32>
    %c5 = arith.constant 5 : index
    %c0_36 = arith.constant 0 : index
    %82 = vector.load %arg3[%c5, %c0_36] : memref<8x16xf32, #tpu.memory_space<vmem>>, vector<1x16xf32>
    %83 = vector.broadcast %82 : vector<1x16xf32> to vector<32x16xf32>
    %84 = arith.addf %81, %83 : vector<32x16xf32>
    %85 = arith.truncf %84 : vector<32x16xf32> to vector<32x16xbf16>
    %86 = vector.shape_cast %85 : vector<32x16xbf16> to vector<2x16x16xbf16>
    "tpu.trace_start"() <{level = 10 : i32, message = "bij,bjc->bic"}> : () -> ()
    %cst_37 = arith.constant dense<0.000000e+00> : vector<2x16x16xf32>
    %87 = tpu.matmul %0, %86, %cst_37 {dimension_numbers = #tpu.dot_dimension_numbers<[2], [1], [1], [2], [0, 0, 0, 1, 1, 2], [0], [0]>} : vector<2x16x16xbf16>, vector<2x16x16xbf16>, vector<2x16x16xf32> -> vector<2x16x16xf32>
    "tpu.trace_stop"() : () -> ()
    %88 = vector.broadcast %7 : vector<2x16x1xf32> to vector<2x16x16xf32>
    %89 = arith.mulf %87, %88 : vector<2x16x16xf32>
    %90 = vector.shape_cast %89 : vector<2x16x16xf32> to vector<32x16xf32>
    %91 = arith.truncf %90 : vector<32x16xf32> to vector<32x16xbf16>
    %c64 = arith.constant 64 : index
    %c0_38 = arith.constant 0 : index
    %92 = vector.load %arg2[%c64, %c0_38] : memref<96x16xbf16, #tpu.memory_space<vmem>>, vector<16x16xbf16>
    %cst_39 = arith.constant dense<0.000000e+00> : vector<32x16xf32>
    %93 = tpu.matmul %91, %92, %cst_39 {dimension_numbers = #tpu.dot_dimension_numbers<[1], [0], [0], [1], [0, 0, 1, 1], [], []>} : vector<32x16xbf16>, vector<16x16xbf16>, vector<32x16xf32> -> vector<32x16xf32>
    %c80 = arith.constant 80 : index
    %c0_40 = arith.constant 0 : index
    %94 = vector.load %arg2[%c80, %c0_40] : memref<96x16xbf16, #tpu.memory_space<vmem>>, vector<16x16xbf16>
    %cst_41 = arith.constant dense<0.000000e+00> : vector<32x16xf32>
    %95 = tpu.matmul %85, %94, %cst_41 {dimension_numbers = #tpu.dot_dimension_numbers<[1], [0], [0], [1], [0, 0, 1, 1], [], []>} : vector<32x16xbf16>, vector<16x16xbf16>, vector<32x16xf32> -> vector<32x16xf32>
    %96 = arith.addf %93, %95 : vector<32x16xf32>
    %c6 = arith.constant 6 : index
    %c0_42 = arith.constant 0 : index
    %97 = vector.load %arg3[%c6, %c0_42] : memref<8x16xf32, #tpu.memory_space<vmem>>, vector<1x16xf32>
    %98 = vector.broadcast %97 : vector<1x16xf32> to vector<32x16xf32>
    %99 = arith.addf %96, %98 : vector<32x16xf32>
    %c0_43 = arith.constant 0 : index
    %c0_44 = arith.constant 0 : index
    %100 = vector.load %arg4[%c0_43, %c0_44] : memref<32x48xf32, #tpu.memory_space<vmem>>, vector<32x16xf32>
    tpu.vector_store %arg4[%c0_43, %c0_44], %46 {strides = array<i32>} : memref<32x48xf32, #tpu.memory_space<vmem>>, vector<32x16xf32>,
    %c0_45 = arith.constant 0 : index
    %c16_46 = arith.constant 16 : index
    %101 = vector.load %arg4[%c0_45, %c16_46] : memref<32x48xf32, #tpu.memory_space<vmem>>, vector<32x16xf32>
    tpu.vector_store %arg4[%c0_45, %c16_46], %84 {strides = array<i32>} : memref<32x48xf32, #tpu.memory_space<vmem>>, vector<32x16xf32>,
    %c0_47 = arith.constant 0 : index
    %c32_48 = arith.constant 32 : index
    %102 = vector.load %arg4[%c0_47, %c32_48] : memref<32x48xf32, #tpu.memory_space<vmem>>, vector<32x16xf32>
    tpu.vector_store %arg4[%c0_47, %c32_48], %99 {strides = array<i32>} : memref<32x48xf32, #tpu.memory_space<vmem>>, vector<32x16xf32>,
    return
  }
}

module attributes {stable_mosaic.version = 11 : i64} {
  func.func @kernel(%arg0: memref<2x16x8xbf16, #tpu.memory_space<vmem>>, %arg1: memref<2x16x16xbf16, #tpu.memory_space<vmem>>, %arg2: memref<144x16xbf16, #tpu.memory_space<vmem>>, %arg3: memref<8x16xf32, #tpu.memory_space<vmem>>, %arg4: memref<32x16xf32, #tpu.memory_space<vmem>>) attributes {dimension_semantics = [], scalar_prefetch = 0 : i64, scratch_operands = 0 : i64, tpu.core_type = #tpu.core_type<tc>} {
    %c0 = arith.constant 0 : index
    %c0_0 = arith.constant 0 : index
    %c0_1 = arith.constant 0 : index
    %0 = vector.load %arg1[%c0, %c0_0, %c0_1] : memref<2x16x16xbf16, #tpu.memory_space<vmem>>, vector<2x16x16xbf16>
    %1 = arith.extf %0 : vector<2x16x16xbf16> to vector<2x16x16xf32>
    %cst = arith.constant dense<0.000000e+00> : vector<2x16xf32>
    %2 = vector.multi_reduction <add>, %1, %cst [2] : vector<2x16x16xf32> to vector<2x16xf32>
    %3 = vector.shape_cast %2 : vector<2x16xf32> to vector<2x16x1xf32>
    %cst_2 = arith.constant 1.000000e+00 : f32
    %4 = vector.broadcast %cst_2 : f32 to vector<2x16x1xf32>
    %5 = arith.maximumf %3, %4 : vector<2x16x1xf32>
    %cst_3 = arith.constant 1.000000e+00 : f32
    %6 = vector.broadcast %cst_3 : f32 to vector<2x16x1xf32>
    %7 = arith.divf %6, %5 : vector<2x16x1xf32>
    %c0_4 = arith.constant 0 : index
    %c0_5 = arith.constant 0 : index
    %c0_6 = arith.constant 0 : index
    %8 = vector.load %arg0[%c0_4, %c0_5, %c0_6] : memref<2x16x8xbf16, #tpu.memory_space<vmem>>, vector<2x16x8xbf16>
    %9 = vector.shape_cast %8 : vector<2x16x8xbf16> to vector<32x8xbf16>
    %10 = vector.shape_cast %9 : vector<32x8xbf16> to vector<2x16x8xbf16>
    "tpu.trace_start"() <{level = 10 : i32, message = "bij,bjc->bic"}> : () -> ()
    %cst_7 = arith.constant dense<0.000000e+00> : vector<2x16x8xf32>
    %11 = tpu.matmul %0, %10, %cst_7 {dimension_numbers = #tpu.dot_dimension_numbers<[2], [1], [1], [2], [0, 0, 0, 1, 1, 2], [0], [0]>} : vector<2x16x16xbf16>, vector<2x16x8xbf16>, vector<2x16x8xf32> -> vector<2x16x8xf32>
    "tpu.trace_stop"() : () -> ()
    %12 = vector.broadcast %7 : vector<2x16x1xf32> to vector<2x16x8xf32>
    %13 = arith.mulf %11, %12 : vector<2x16x8xf32>
    %14 = vector.shape_cast %13 : vector<2x16x8xf32> to vector<32x8xf32>
    %15 = arith.truncf %14 : vector<32x8xf32> to vector<32x8xbf16>
    %c0_8 = arith.constant 0 : index
    %c0_9 = arith.constant 0 : index
    %16 = vector.load %arg2[%c0_8, %c0_9] : memref<144x16xbf16, #tpu.memory_space<vmem>>, vector<8x16xbf16>
    %cst_10 = arith.constant dense<0.000000e+00> : vector<32x16xf32>
    %17 = tpu.matmul %15, %16, %cst_10 {dimension_numbers = #tpu.dot_dimension_numbers<[1], [0], [0], [1], [0, 0, 1, 1], [], []>} : vector<32x8xbf16>, vector<8x16xbf16>, vector<32x16xf32> -> vector<32x16xf32>
    %c16 = arith.constant 16 : index
    %c0_11 = arith.constant 0 : index
    %18 = vector.load %arg2[%c16, %c0_11] : memref<144x16xbf16, #tpu.memory_space<vmem>>, vector<8x16xbf16>
    %cst_12 = arith.constant dense<0.000000e+00> : vector<32x16xf32>
    %19 = tpu.matmul %9, %18, %cst_12 {dimension_numbers = #tpu.dot_dimension_numbers<[1], [0], [0], [1], [0, 0, 1, 1], [], []>} : vector<32x8xbf16>, vector<8x16xbf16>, vector<32x16xf32> -> vector<32x16xf32>
    %20 = arith.addf %17, %19 : vector<32x16xf32>
    %c0_13 = arith.constant 0 : index
    %c0_14 = arith.constant 0 : index
    %21 = vector.load %arg3[%c0_13, %c0_14] : memref<8x16xf32, #tpu.memory_space<vmem>>, vector<1x16xf32>
    %22 = vector.broadcast %21 : vector<1x16xf32> to vector<32x16xf32>
    %23 = arith.addf %20, %22 : vector<32x16xf32>
    %cst_15 = arith.constant 0.000000e+00 : f32
    %24 = vector.broadcast %cst_15 : f32 to vector<32x16xf32>
    %25 = arith.maximumf %23, %24 : vector<32x16xf32>
    %cst_16 = arith.constant dense<0.000000e+00> : vector<16xf32>
    %26 = vector.multi_reduction <add>, %25, %cst_16 [0] : vector<32x16xf32> to vector<16xf32>
    %27 = vector.shape_cast %26 : vector<16xf32> to vector<1x16xf32>
    %cst_17 = arith.constant 3.125000e-02 : f32
    %28 = vector.broadcast %cst_17 : f32 to vector<1x16xf32>
    %29 = arith.mulf %27, %28 : vector<1x16xf32>
    %30 = vector.broadcast %29 : vector<1x16xf32> to vector<32x16xf32>
    %31 = arith.subf %25, %30 : vector<32x16xf32>
    %32 = arith.mulf %31, %31 : vector<32x16xf32>
    %cst_18 = arith.constant dense<0.000000e+00> : vector<16xf32>
    %33 = vector.multi_reduction <add>, %32, %cst_18 [0] : vector<32x16xf32> to vector<16xf32>
    %34 = vector.shape_cast %33 : vector<16xf32> to vector<1x16xf32>
    %cst_19 = arith.constant 3.125000e-02 : f32
    %35 = vector.broadcast %cst_19 : f32 to vector<1x16xf32>
    %36 = arith.mulf %34, %35 : vector<1x16xf32>
    %cst_20 = arith.constant 9.99999974E-6 : f32
    %37 = vector.broadcast %cst_20 : f32 to vector<1x16xf32>
    %38 = arith.addf %36, %37 : vector<1x16xf32>
    %39 = math.rsqrt %38 : vector<1x16xf32>
    %c1 = arith.constant 1 : index
    %c0_21 = arith.constant 0 : index
    %40 = vector.load %arg3[%c1, %c0_21] : memref<8x16xf32, #tpu.memory_space<vmem>>, vector<1x16xf32>
    %41 = arith.mulf %39, %40 : vector<1x16xf32>
    %42 = vector.broadcast %41 : vector<1x16xf32> to vector<32x16xf32>
    %43 = arith.mulf %31, %42 : vector<32x16xf32>
    %c2 = arith.constant 2 : index
    %c0_22 = arith.constant 0 : index
    %44 = vector.load %arg3[%c2, %c0_22] : memref<8x16xf32, #tpu.memory_space<vmem>>, vector<1x16xf32>
    %45 = vector.broadcast %44 : vector<1x16xf32> to vector<32x16xf32>
    %46 = arith.addf %43, %45 : vector<32x16xf32>
    %47 = arith.truncf %46 : vector<32x16xf32> to vector<32x16xbf16>
    %48 = vector.shape_cast %47 : vector<32x16xbf16> to vector<2x16x16xbf16>
    "tpu.trace_start"() <{level = 10 : i32, message = "bij,bjc->bic"}> : () -> ()
    %cst_23 = arith.constant dense<0.000000e+00> : vector<2x16x16xf32>
    %49 = tpu.matmul %0, %48, %cst_23 {dimension_numbers = #tpu.dot_dimension_numbers<[2], [1], [1], [2], [0, 0, 0, 1, 1, 2], [0], [0]>} : vector<2x16x16xbf16>, vector<2x16x16xbf16>, vector<2x16x16xf32> -> vector<2x16x16xf32>
    "tpu.trace_stop"() : () -> ()
    %50 = vector.broadcast %7 : vector<2x16x1xf32> to vector<2x16x16xf32>
    %51 = arith.mulf %49, %50 : vector<2x16x16xf32>
    %52 = vector.shape_cast %51 : vector<2x16x16xf32> to vector<32x16xf32>
    %53 = arith.truncf %52 : vector<32x16xf32> to vector<32x16xbf16>
    %c32 = arith.constant 32 : index
    %c0_24 = arith.constant 0 : index
    %54 = vector.load %arg2[%c32, %c0_24] : memref<144x16xbf16, #tpu.memory_space<vmem>>, vector<16x16xbf16>
    %cst_25 = arith.constant dense<0.000000e+00> : vector<32x16xf32>
    %55 = tpu.matmul %53, %54, %cst_25 {dimension_numbers = #tpu.dot_dimension_numbers<[1], [0], [0], [1], [0, 0, 1, 1], [], []>} : vector<32x16xbf16>, vector<16x16xbf16>, vector<32x16xf32> -> vector<32x16xf32>
    %c48 = arith.constant 48 : index
    %c0_26 = arith.constant 0 : index
    %56 = vector.load %arg2[%c48, %c0_26] : memref<144x16xbf16, #tpu.memory_space<vmem>>, vector<16x16xbf16>
    %cst_27 = arith.constant dense<0.000000e+00> : vector<32x16xf32>
    %57 = tpu.matmul %47, %56, %cst_27 {dimension_numbers = #tpu.dot_dimension_numbers<[1], [0], [0], [1], [0, 0, 1, 1], [], []>} : vector<32x16xbf16>, vector<16x16xbf16>, vector<32x16xf32> -> vector<32x16xf32>
    %58 = arith.addf %55, %57 : vector<32x16xf32>
    %c3 = arith.constant 3 : index
    %c0_28 = arith.constant 0 : index
    %59 = vector.load %arg3[%c3, %c0_28] : memref<8x16xf32, #tpu.memory_space<vmem>>, vector<1x16xf32>
    %60 = vector.broadcast %59 : vector<1x16xf32> to vector<32x16xf32>
    %61 = arith.addf %58, %60 : vector<32x16xf32>
    %cst_29 = arith.constant 0.000000e+00 : f32
    %62 = vector.broadcast %cst_29 : f32 to vector<32x16xf32>
    %63 = arith.maximumf %61, %62 : vector<32x16xf32>
    %cst_30 = arith.constant dense<0.000000e+00> : vector<16xf32>
    %64 = vector.multi_reduction <add>, %63, %cst_30 [0] : vector<32x16xf32> to vector<16xf32>
    %65 = vector.shape_cast %64 : vector<16xf32> to vector<1x16xf32>
    %cst_31 = arith.constant 3.125000e-02 : f32
    %66 = vector.broadcast %cst_31 : f32 to vector<1x16xf32>
    %67 = arith.mulf %65, %66 : vector<1x16xf32>
    %68 = vector.broadcast %67 : vector<1x16xf32> to vector<32x16xf32>
    %69 = arith.subf %63, %68 : vector<32x16xf32>
    %70 = arith.mulf %69, %69 : vector<32x16xf32>
    %cst_32 = arith.constant dense<0.000000e+00> : vector<16xf32>
    %71 = vector.multi_reduction <add>, %70, %cst_32 [0] : vector<32x16xf32> to vector<16xf32>
    %72 = vector.shape_cast %71 : vector<16xf32> to vector<1x16xf32>
    %cst_33 = arith.constant 3.125000e-02 : f32
    %73 = vector.broadcast %cst_33 : f32 to vector<1x16xf32>
    %74 = arith.mulf %72, %73 : vector<1x16xf32>
    %cst_34 = arith.constant 9.99999974E-6 : f32
    %75 = vector.broadcast %cst_34 : f32 to vector<1x16xf32>
    %76 = arith.addf %74, %75 : vector<1x16xf32>
    %77 = math.rsqrt %76 : vector<1x16xf32>
    %c4 = arith.constant 4 : index
    %c0_35 = arith.constant 0 : index
    %78 = vector.load %arg3[%c4, %c0_35] : memref<8x16xf32, #tpu.memory_space<vmem>>, vector<1x16xf32>
    %79 = arith.mulf %77, %78 : vector<1x16xf32>
    %80 = vector.broadcast %79 : vector<1x16xf32> to vector<32x16xf32>
    %81 = arith.mulf %69, %80 : vector<32x16xf32>
    %c5 = arith.constant 5 : index
    %c0_36 = arith.constant 0 : index
    %82 = vector.load %arg3[%c5, %c0_36] : memref<8x16xf32, #tpu.memory_space<vmem>>, vector<1x16xf32>
    %83 = vector.broadcast %82 : vector<1x16xf32> to vector<32x16xf32>
    %84 = arith.addf %81, %83 : vector<32x16xf32>
    %85 = arith.truncf %84 : vector<32x16xf32> to vector<32x16xbf16>
    %86 = vector.shape_cast %85 : vector<32x16xbf16> to vector<2x16x16xbf16>
    "tpu.trace_start"() <{level = 10 : i32, message = "bij,bjc->bic"}> : () -> ()
    %cst_37 = arith.constant dense<0.000000e+00> : vector<2x16x16xf32>
    %87 = tpu.matmul %0, %86, %cst_37 {dimension_numbers = #tpu.dot_dimension_numbers<[2], [1], [1], [2], [0, 0, 0, 1, 1, 2], [0], [0]>} : vector<2x16x16xbf16>, vector<2x16x16xbf16>, vector<2x16x16xf32> -> vector<2x16x16xf32>
    "tpu.trace_stop"() : () -> ()
    %88 = vector.broadcast %7 : vector<2x16x1xf32> to vector<2x16x16xf32>
    %89 = arith.mulf %87, %88 : vector<2x16x16xf32>
    %90 = vector.shape_cast %89 : vector<2x16x16xf32> to vector<32x16xf32>
    %91 = arith.truncf %90 : vector<32x16xf32> to vector<32x16xbf16>
    %c64 = arith.constant 64 : index
    %c0_38 = arith.constant 0 : index
    %92 = vector.load %arg2[%c64, %c0_38] : memref<144x16xbf16, #tpu.memory_space<vmem>>, vector<16x16xbf16>
    %cst_39 = arith.constant dense<0.000000e+00> : vector<32x16xf32>
    %93 = tpu.matmul %91, %92, %cst_39 {dimension_numbers = #tpu.dot_dimension_numbers<[1], [0], [0], [1], [0, 0, 1, 1], [], []>} : vector<32x16xbf16>, vector<16x16xbf16>, vector<32x16xf32> -> vector<32x16xf32>
    %c80 = arith.constant 80 : index
    %c0_40 = arith.constant 0 : index
    %94 = vector.load %arg2[%c80, %c0_40] : memref<144x16xbf16, #tpu.memory_space<vmem>>, vector<16x16xbf16>
    %cst_41 = arith.constant dense<0.000000e+00> : vector<32x16xf32>
    %95 = tpu.matmul %85, %94, %cst_41 {dimension_numbers = #tpu.dot_dimension_numbers<[1], [0], [0], [1], [0, 0, 1, 1], [], []>} : vector<32x16xbf16>, vector<16x16xbf16>, vector<32x16xf32> -> vector<32x16xf32>
    %96 = arith.addf %93, %95 : vector<32x16xf32>
    %c6 = arith.constant 6 : index
    %c0_42 = arith.constant 0 : index
    %97 = vector.load %arg3[%c6, %c0_42] : memref<8x16xf32, #tpu.memory_space<vmem>>, vector<1x16xf32>
    %98 = vector.broadcast %97 : vector<1x16xf32> to vector<32x16xf32>
    %99 = arith.addf %96, %98 : vector<32x16xf32>
    %100 = arith.truncf %46 : vector<32x16xf32> to vector<32x16xbf16>
    %c96 = arith.constant 96 : index
    %c0_43 = arith.constant 0 : index
    %101 = vector.load %arg2[%c96, %c0_43] : memref<144x16xbf16, #tpu.memory_space<vmem>>, vector<16x16xbf16>
    %cst_44 = arith.constant dense<0.000000e+00> : vector<32x16xf32>
    %102 = tpu.matmul %100, %101, %cst_44 {dimension_numbers = #tpu.dot_dimension_numbers<[1], [0], [0], [1], [0, 0, 1, 1], [], []>} : vector<32x16xbf16>, vector<16x16xbf16>, vector<32x16xf32> -> vector<32x16xf32>
    %103 = arith.truncf %84 : vector<32x16xf32> to vector<32x16xbf16>
    %c112 = arith.constant 112 : index
    %c0_45 = arith.constant 0 : index
    %104 = vector.load %arg2[%c112, %c0_45] : memref<144x16xbf16, #tpu.memory_space<vmem>>, vector<16x16xbf16>
    %cst_46 = arith.constant dense<0.000000e+00> : vector<32x16xf32>
    %105 = tpu.matmul %103, %104, %cst_46 {dimension_numbers = #tpu.dot_dimension_numbers<[1], [0], [0], [1], [0, 0, 1, 1], [], []>} : vector<32x16xbf16>, vector<16x16xbf16>, vector<32x16xf32> -> vector<32x16xf32>
    %106 = arith.addf %102, %105 : vector<32x16xf32>
    %107 = arith.truncf %99 : vector<32x16xf32> to vector<32x16xbf16>
    %c128 = arith.constant 128 : index
    %c0_47 = arith.constant 0 : index
    %108 = vector.load %arg2[%c128, %c0_47] : memref<144x16xbf16, #tpu.memory_space<vmem>>, vector<16x16xbf16>
    %cst_48 = arith.constant dense<0.000000e+00> : vector<32x16xf32>
    %109 = tpu.matmul %107, %108, %cst_48 {dimension_numbers = #tpu.dot_dimension_numbers<[1], [0], [0], [1], [0, 0, 1, 1], [], []>} : vector<32x16xbf16>, vector<16x16xbf16>, vector<32x16xf32> -> vector<32x16xf32>
    %110 = arith.addf %106, %109 : vector<32x16xf32>
    %c7 = arith.constant 7 : index
    %c0_49 = arith.constant 0 : index
    %111 = vector.load %arg3[%c7, %c0_49] : memref<8x16xf32, #tpu.memory_space<vmem>>, vector<1x16xf32>
    %112 = vector.broadcast %111 : vector<1x16xf32> to vector<32x16xf32>
    %113 = arith.addf %110, %112 : vector<32x16xf32>
    %c0_50 = arith.constant 0 : index
    %c0_51 = arith.constant 0 : index
    %114 = vector.load %arg4[%c0_50, %c0_51] : memref<32x16xf32, #tpu.memory_space<vmem>>, vector<32x16xf32>
    tpu.vector_store %arg4[%c0_50, %c0_51], %113 {strides = array<i32>} : memref<32x16xf32, #tpu.memory_space<vmem>>, vector<32x16xf32>,
    return
  }
}

</mosaic_0001>

<bundles_post_ra>
// kernel: _lambda_.3
= control target key start
LH: loop header
LB: loop body
LE: loop exit
PB: predicated region body
PF: predicated region fallthrough
CT: control target
= control target key end

     0   :  { %9 = vsyncpa [#allocation3], 0  ;;  %s979_s0 = inlined_call_operand.vmem [shape: bf16[2,16,8], index: 0, kind: input, shape index: {}]   ;;  %s980_s1 = inlined_call_operand.vmem [shape: bf16[2,16,16], index: 1, kind: input, shape index: {}]   ;;  %s981_s2 = inlined_call_operand.vmem [shape: bf16[96,16], index: 2, kind: input, shape index: {}]   ;;  %s982_s3 = inlined_call_operand.hbm [shape: f32[8,16], index: 3, kind: input, shape index: {}]   ;;  %s983_s4 = inlined_call_operand.hbm [shape: f32[32,48], index: 4, kind: output, shape index: {}]  }
   0x1   :  { %10 = vsyncpa [#allocation4], 0  ;;  %s22_s17 = sshll.u32 %s982_s3, 4  ;;  %s820_s18 = smov [#allocation2]   ;;  %s23_s17 = int_to_ptr.hbm [resolvable:$true] %s22_s17 }
   0x2   :  { %s24_s19 = sshll.u32 %s820_s18, 4  ;;  %s25_s19 = int_to_ptr.vmem [resolvable:$true] %s24_s19 }
   0x3   :  { %27 = dma.hbm_to_vmem [thread:$0]  %s23_s17, 128, %s25_s19, [#allocation3]  }
   0x4   :  { %816 = dma.done.wait [#allocation3], 128  }
   0x5   :  { %817 = vsyncadd [#allocation3], 4294967168  ;;  %v739_v0 = vld [vmem:[%s979_s0] sm:$0xff]  ;;  %v35_v1 = vld [vmem:[%s980_s1 + $0x8] sm:$0xff]   ;;  %vm41_vm0 = vcmask 130048   ;;  %vm193_vm1 = vcmask 1043456  }
   0x6   :  { %v33_v2 = vld [vmem:[%s980_s1] sm:$0xff]   ;;  %v39_v3 = vunpack.c.l.bf16 %v35_v1  ;;  %v740_v6 = vld [vmem:[%s979_s0 + $0x8] sm:$0xff]  ;;  %143 = vmatpush.bf16.msra.mxu0 %v739_v0  ;;  %v40_v10 = vunpack.c.h.bf16 %v35_v1  ;;  %vm186_vm2 = vcmask 64512   ;;  %s821_s11 = smov 16   ;;  %s823_s16 = smov [#allocation5]  }
   0x7   :  { %v37_v4 = vunpack.c.l.bf16 %v33_v2  ;;  %v866_v5 = vld [vmem:[%s980_s1] sm:$0xff]  ;;  %v874_v7 = vld [vmem:[%s980_s1 + $0x8] sm:$0xff]  ;;  %171 = vmatpush.bf16.msra.mxu1 %v740_v6  ;;  %v38_v11 = vunpack.c.h.bf16 %v33_v2  ;;  %s672_s17 = sshll.u32 %s823_s16, 4  ;;  %s674_s20 = sshll.u32 %s983_s4, 4  ;;  %s673_s17 = int_to_ptr.vmem [resolvable:$true] %s672_s17  ;;  %s675_s20 = int_to_ptr.hbm [resolvable:$true] %s674_s20 }
   0x8   :  { %v48_v8 = vsel %vm41_vm0, %v39_v3, 0.0  ;;  %v51_v12 = vsel %vm41_vm0, %v40_v10, 0.0  ;;  %v185_v14 = vld [vmem:[%s981_s2 + $0x8] sm:$0xf]  ;;  %v184_v16 = vld [vmem:[%s981_s2] sm:$0xf] }
   0x9   :  { %v42_v9 = vsel %vm41_vm0, %v37_v4, 0.0  ;;  %49 = vadd.xlane.f32.xlu1 %v48_v8  ;;  %695 = vmatmul.msk.bf16.vlgmr.msra.gmra.mxu0 %vm41_vm0, %v866_v5  ;;  %v45_v13 = vsel %vm41_vm0, %v38_v11, 0.0  ;;  %v195_v15 = vsel %vm193_vm1, %v185_v14, 0  ;;  %v223_v17 = vsel %vm193_vm1, %v184_v16, 0  ;;  %s824_s21 = smov 128   ;;  %s825_s22 = smov 8  }
   0xa   :  { %43 = vadd.xlane.f32.xlu0 %v42_v9  ;;  %704 = vmatmul.msk.bf16.vlgmr.msra.gmra.mxu1 %vm41_vm0, %v874_v7 }
   0xb   :  { %204 = vmatpush.bf16.msra.mxu2 %v195_v15  ;;  %232 = vmatpush.bf16.msra.mxu3 %v223_v17 }
   0xe   :  { %705 = vmatmul.msk.bf16.vlgmr.msra.gmra.mxu2 %vm186_vm2, %v739_v0 }
  0x11   :  { %52 = vadd.xlane.f32.xlu1 %v51_v12 }
  0x12   :  { %46 = vadd.xlane.f32.xlu0 %v45_v13 }
  0x1e   :  { %706 = vmatmul.msk.bf16.gmra.mxu2 %vm186_vm2, %v740_v6 }
  0x7c   :  { %v50_v18 = vpop.xlane.xlu1 %49 }
  0x7d   :  { %v44_v19 = vpop.xlane.xlu0 %43  ;;  %v891_v23 = vmax.f32 %v50_v18, 1.0 }
  0x7e   :  { %v54_v20 = vmax.f32 %v44_v19, 1.0 }
  0x7f   :  { %vm93_vm13 = vweird.f32 %v891_v23  ;;  %v99_v63 = vand.u32 2147483648, %v891_v23  ;;  %v97_v1 = vand.u32 2147483647, %v891_v23 }
  0x80   :  { %756 = vrcp.f32 %v54_v20  ;;  %v69_v36 = vand.u32 2147483648, %v54_v20  ;;  %vm63_vm4 = vweird.f32 %v54_v20  ;;  %v67_v38 = vand.u32 2147483647, %v54_v20 }
  0x81   :  { %v100_v4 = vor.u32 1.1754944e-38, %v99_v63 }
  0x82   :  { %v70_v45 = vor.u32 1.1754944e-38, %v69_v36  ;;  %vm68_vm7 = vcmp.eq.f32.partialorder %v67_v38, 8.507059e+37 }
  0x84   :  { %v53_v21 = vpop.xlane.xlu1 %52 }
  0x85   :  { %v47_v22 = vpop.xlane.xlu0 %46  ;;  %v893_v24 = vmax.f32 %v53_v21, 1.0  ;;  %v751_v21 = vld [vmem:[#allocation2] ss:$0 sm:$0xff] }
  0x86   :  { %v55_v25 = vmax.f32 %v47_v22, 1.0  ;;  %v757_v26 = vpop.eup %756  ;;  %v145_v32 = vpop.f32.mrf.mxu0 }
  0x87   :  { %v59_v27 = vmul.f32 %v757_v26, %v54_v20  ;;  %758 = vrcp.f32 %v893_v24  ;;  %vm64_vm3 = vweird.f32 %v757_v26  ;;  %v173_v57 = vpop.f32.mrf.mxu1  ;;  %vm108_vm11 = vweird.f32 %v893_v24 }
  0x88   :  { %760 = vrcp.f32 %v55_v25  ;;  %vm65_vm5 = vmor %vm63_vm4, %vm64_vm3  ;;  %v84_v41 = vand.u32 2147483648, %v55_v25  ;;  %v82_v44 = vand.u32 2147483647, %v55_v25  ;;  %vm78_vm8 = vweird.f32 %v55_v25 }
  0x89   :  { %762 = vrcp.f32 %v891_v23  ;;  %v60_v28 = vsub.f32 1.0, %v59_v27  ;;  %v114_v60 = vand.u32 2147483648, %v893_v24  ;;  %v112_v62 = vand.u32 2147483647, %v893_v24 }
  0x8a   :  { %v85_v49 = vor.u32 1.1754944e-38, %v84_v41  ;;  %vm83_vm10 = vcmp.eq.f32.partialorder %v82_v44, 8.507059e+37  ;;  %vm98_vm4 = vcmp.eq.f32.partialorder %v97_v1, 8.507059e+37 }
  0x8b   :  { %v61_v29 = vmul.f32 %v757_v26, %v60_v28  ;;  %v115_v2 = vor.u32 1.1754944e-38, %v114_v60  ;;  %vm113_vm3 = vcmp.eq.f32.partialorder %v112_v62, 8.507059e+37 }
  0x8d   :  { %v759_v30 = vpop.eup %758  ;;  %v62_v35 = vadd.f32 %v757_v26, %v61_v29 }
  0x8e   :  { %v761_v31 = vpop.eup %760  ;;  %v104_v37 = vmul.f32 %v759_v30, %v893_v24  ;;  %v147_v53 = vpop.f32.mrf.mxu0  ;;  %vm109_vm12 = vweird.f32 %v759_v30 }
  0x8f   :  { %v763_v33 = vpop.eup %762  ;;  %v74_v34 = vmul.f32 %v761_v31, %v55_v25  ;;  %v66_v42 = vsel %vm65_vm5, %v757_v26, %v62_v35  ;;  %vm79_vm6 = vweird.f32 %v761_v31  ;;  %vm110_vm15 = vmor %vm108_vm11, %vm109_vm12  ;;  %v175_v9 = vpop.f32.mrf.mxu1 }
  0x90   :  { %v89_v40 = vmul.f32 %v763_v33, %v891_v23  ;;  %v105_v47 = vsub.f32 1.0, %v104_v37  ;;  %v900_v48 = vsel %vm68_vm7, %v70_v45, %v66_v42  ;;  %vm80_vm9 = vmor %vm78_vm8, %vm79_vm6  ;;  %vm94_vm14 = vweird.f32 %v763_v33 }
  0x91   :  { %v75_v39 = vsub.f32 1.0, %v74_v34  ;;  %v178_v54 = vmul.f32 %v145_v32, %v900_v48  ;;  %vm95_vm1 = vmor %vm93_vm13, %vm94_vm14  ;;  %v206_v14 = vpop.f32.mrf.mxu2 }
  0x92   :  { %v90_v50 = vsub.f32 1.0, %v89_v40  ;;  %v106_v56 = vmul.f32 %v759_v30, %v105_v47 }
  0x93   :  { %v76_v43 = vmul.f32 %v761_v31, %v75_v39 }
  0x94   :  { %v91_v58 = vmul.f32 %v763_v33, %v90_v50  ;;  %v107_v61 = vadd.f32 %v759_v30, %v106_v56 }
  0x95   :  { %v77_v46 = vadd.f32 %v761_v31, %v76_v43 }
  0x96   :  { %v92_v0 = vadd.f32 %v763_v33, %v91_v58  ;;  %v111_v3 = vsel %vm110_vm15, %v759_v30, %v107_v61 }
  0x97   :  { %v81_v51 = vsel %vm80_vm9, %v761_v31, %v77_v46  ;;  %v913_v8 = vsel %vm113_vm3, %v115_v2, %v111_v3 }
  0x98   :  { %v902_v52 = vsel %vm83_vm10, %v85_v49, %v81_v51  ;;  %v96_v6 = vsel %vm95_vm1, %v763_v33, %v92_v0  ;;  %v181_v11 = vmul.f32 %v175_v9, %v913_v8  ;;  %vm642_vm10 = vcmask 261248  }
  0x99   :  { %v179_v55 = vmul.f32 %v147_v53, %v902_v52  ;;  %v915_v10 = vsel %vm98_vm4, %v100_v4, %v96_v6  ;;  %v208_v16 = vpop.f32.mrf.mxu2 }
  0x9a   :  { %v180_v12 = vmul.f32 %v173_v57, %v915_v10 }
  0x9b   :  { %v182_v59 = vpack.c.bf16 %v179_v55, %v178_v54 }
  0x9c   :  { %v183_v13 = vpack.c.bf16 %v181_v11, %v180_v12 }
  0x9d   :  { %707 = vmatmul.msk.bf16.vlgmr.msra.gmra.mxu3 %vm186_vm2, %v182_v59 }
  0xa1   :  { %v211_v19 = vpop.f32.mrf.mxu2 }
  0xa9   :  { %v213_v30 = vpop.f32.mrf.mxu2 }
  0xad   :  { %708 = vmatmul.msk.bf16.gmra.mxu3 %vm186_vm2, %v183_v13 }
 0x120   :  { %v234_v15 = vpop.f32.mrf.mxu3 }
 0x121   :  { %v235_v20 = vadd.f32 %v234_v15, %v206_v14 }
 0x123   :  { %v246_v25 = vadd.f32 %v751_v21, %v235_v20  ;;  %v301_v20 = vld [vmem:[#allocation2 + $0x1] sm:$0x1] }
 0x125   :  { %v250_v28 = vmax.f32 %v246_v25, 0.0 }
 0x127   :  { %v254_v34 = vsel %vm41_vm0, %v250_v28, 0.0 }
 0x128   :  { %v236_v17 = vpop.f32.mrf.mxu3 }
 0x129   :  { %v237_v18 = vadd.f32 %v236_v17, %v208_v16 }
 0x12b   :  { %v247_v23 = vadd.f32 %v751_v21, %v237_v18 }
 0x12d   :  { %v251_v27 = vmax.f32 %v247_v23, 0.0 }
 0x12f   :  { %v255_v32 = vsel %vm41_vm0, %v251_v27, 0.0 }
 0x130   :  { %v239_v22 = vpop.f32.mrf.mxu3  ;;  %v256_v37 = vadd.f32 %v255_v32, %v254_v34 }
 0x131   :  { %v240_v24 = vadd.f32 %v239_v22, %v211_v19 }
 0x133   :  { %v248_v26 = vadd.f32 %v751_v21, %v240_v24  ;;  %v752_v24 = vld [vmem:[#allocation2 + $0x2] ss:$0 sm:$0xff] }
 0x135   :  { %v252_v29 = vmax.f32 %v248_v26, 0.0 }
 0x137   :  { %v257_v35 = vsel %vm41_vm0, %v252_v29, 0.0 }
 0x138   :  { %v241_v31 = vpop.f32.mrf.mxu3  ;;  %v258_v39 = vadd.f32 %v257_v35, %v256_v37 }
 0x139   :  { %v242_v33 = vadd.f32 %v241_v31, %v213_v30 }
 0x13b   :  { %v249_v36 = vadd.f32 %v751_v21, %v242_v33 }
 0x13d   :  { %v253_v38 = vmax.f32 %v249_v36, 0.0 }
 0x13f   :  { %v259_v40 = vsel %vm41_vm0, %v253_v38, 0.0 }
 0x140   :  { %v260_v41 = vadd.f32 %v259_v40, %v258_v39 }
 0x142   :  { %v261_v42 = vrot.slane %v260_v41, 4 }
 0x144   :  { %v262_v43 = vadd.f32 %v261_v42, %v260_v41  ;;  %v742_v41 = vld [vmem:[%s981_s2 + $0x18] sm:$0xff] }
 0x146   :  { %v263_v44 = vrot.slane %v262_v43, 2 }
 0x148   :  { %v264_v45 = vadd.f32 %v263_v44, %v262_v43  ;;  %v741_v44 = vld [vmem:[%s981_s2 + $0x10] sm:$0xff] }
 0x14a   :  { %v265_v46 = vrot.slane %v264_v45, 1 }
 0x14c   :  { %v266_v47 = vadd.f32 %v265_v46, %v264_v45 }
 0x14e   :  { %v267_v49 = vmul.f32 0.03125, %v266_v47 }
 0x150   :  { %v268_v50 = vsub.f32 %v250_v28, %v267_v49  ;;  %v269_v51 = vsub.f32 %v251_v27, %v267_v49  ;;  %v270_v53 = vsub.f32 %v252_v29, %v267_v49  ;;  %v271_v54 = vsub.f32 %v253_v38, %v267_v49 }
 0x152   :  { %v272_v55 = vmul.f32 %v268_v50, %v268_v50  ;;  %v273_v56 = vmul.f32 %v269_v51, %v269_v51  ;;  %v274_v57 = vmul.f32 %v270_v53, %v270_v53  ;;  %v275_v58 = vmul.f32 %v271_v54, %v271_v54 }
 0x154   :  { %v276_v59 = vsel %vm41_vm0, %v272_v55, 0.0  ;;  %v277_v60 = vsel %vm41_vm0, %v273_v56, 0.0  ;;  %v279_v62 = vsel %vm41_vm0, %v274_v57, 0.0  ;;  %v281_v0 = vsel %vm41_vm0, %v275_v58, 0.0 }
 0x155   :  { %v278_v61 = vadd.f32 %v277_v60, %v276_v59 }
 0x157   :  { %v280_v63 = vadd.f32 %v279_v62, %v278_v61 }
 0x159   :  { %v282_v1 = vadd.f32 %v281_v0, %v280_v63  ;;  %v753_v0 = vld [vmem:[#allocation2 + $0x3] ss:$0 sm:$0xff] }
 0x15b   :  { %v283_v2 = vrot.slane %v282_v1, 4 }
 0x15d   :  { %v284_v3 = vadd.f32 %v283_v2, %v282_v1 }
 0x15f   :  { %v285_v4 = vrot.slane %v284_v3, 2 }
 0x161   :  { %v286_v6 = vadd.f32 %v285_v4, %v284_v3 }
 0x163   :  { %v287_v9 = vrot.slane %v286_v6, 1 }
 0x165   :  { %v288_v11 = vadd.f32 %v287_v9, %v286_v6 }
 0x167   :  { %v289_v12 = vmul.f32 0.03125, %v288_v11 }
 0x169   :  { %v290_v13 = vadd.f32 1e-05, %v289_v12 }
 0x16b   :  { %764 = vrsqrt.f32 %v290_v13  ;;  %vm297_vm5 = vweird.f32 %v290_v13 }
 0x171   :  { %v765_v14 = vpop.eup %764 }
 0x172   :  { %v292_v15 = vmul.f32 %v765_v14, %v290_v13  ;;  %vm298_vm2 = vweird.f32 %v765_v14 }
 0x173   :  { %vm299_vm6 = vmor %vm297_vm5, %vm298_vm2 }
 0x174   :  { %v293_v16 = vmul.f32 %v765_v14, %v292_v15 }
 0x176   :  { %v294_v17 = vmul.f32 0.5, %v293_v16 }
 0x178   :  { %v295_v18 = vsub.f32 1.5, %v294_v17 }
 0x17a   :  { %v296_v19 = vmul.f32 %v765_v14, %v295_v18 }
 0x17c   :  { %v300_v21 = vsel %vm299_vm6, %v765_v14, %v296_v19 }
 0x17d   :  { %v302_v22 = vmul.f32 %v301_v20, %v300_v21 }
 0x17f   :  { %v303_v23 = vperm.slane %v302_v22, 0 }
 0x181   :  { %v307_v25 = vmul.f32 %v303_v23, %v271_v54  ;;  %v304_v26 = vmul.f32 %v303_v23, %v268_v50  ;;  %v305_v27 = vmul.f32 %v303_v23, %v269_v51  ;;  %v306_v28 = vmul.f32 %v303_v23, %v270_v53 }
 0x183   :  { %v310_v29 = vadd.f32 %v752_v24, %v304_v26  ;;  %v311_v30 = vadd.f32 %v752_v24, %v305_v27  ;;  %v312_v31 = vadd.f32 %v752_v24, %v306_v28  ;;  %v313_v32 = vadd.f32 %v752_v24, %v307_v25 }
 0x185   :  { %v314_v33 = vpack.c.bf16 %v310_v29, %v310_v29  ;;  %v315_v34 = vpack.c.bf16 %v311_v30, %v311_v30  ;;  %622 = vst.msk [vmem:[#allocation5] sm:$0xff] %vm41_vm0, %v310_v29  ;;  %v316_v35 = vpack.c.bf16 %v312_v31, %v312_v31  ;;  %v317_v36 = vpack.c.bf16 %v313_v32, %v313_v32 }
 0x186   :  { %623 = vst.msk [vmem:[#allocation5 + $0x8] sm:$0xff] %vm41_vm0, %v311_v30 }
 0x187   :  { %v320_v37 = vunpack.c.l.b16 %v314_v33  ;;  %v321_v38 = vunpack.c.l.b16 %v315_v34  ;;  %v340_v39 = vunpack.c.l.b16 %v316_v35  ;;  %v341_v40 = vunpack.c.l.b16 %v317_v36  ;;  %624 = vst.msk [vmem:[#allocation5 + $0x10] sm:$0xff] %vm41_vm0, %v312_v31 }
 0x188   :  { %625 = vst.msk [vmem:[#allocation5 + $0x18] sm:$0xff] %vm41_vm0, %v313_v32 }
 0x189   :  { %v322_v42 = vpack.c.b16 %v321_v38, %v320_v37  ;;  %v342_v43 = vpack.c.b16 %v341_v40, %v340_v39 }
 0x18b   :  { %331 = vmatpush.bf16.msrb.mxu0 %v322_v42  ;;  %351 = vmatpush.bf16.msrb.mxu1 %v342_v43 }
 0x18e   :  { %709 = vmatmul.msk.bf16.vlgmr.msrb.gmra.mxu0 %vm41_vm0, %v866_v5  ;;  %710 = vmatmul.msk.bf16.vlgmr.msrb.gmra.mxu1 %vm41_vm0, %v874_v7 }
 0x18f   :  { %387 = vmatpush.bf16.msra.mxu0 %v742_v41  ;;  %418 = vmatpush.bf16.msra.mxu1 %v741_v44 }
 0x19e   :  { %715 = vmatmul.msk.bf16.vlgmr.msra.gmra.mxu0 %vm41_vm0, %v322_v42 }
 0x1ae   :  { %716 = vmatmul.msk.bf16.gmra.mxu0 %vm41_vm0, %v342_v43 }
 0x20b   :  { %v333_v45 = vpop.f32.mrf.mxu0  ;;  %v353_v50 = vpop.f32.mrf.mxu1 }
 0x20c   :  { %v358_v47 = vmul.f32 %v333_v45, %v900_v48  ;;  %v360_v55 = vmul.f32 %v353_v50, %v915_v10 }
 0x213   :  { %v335_v46 = vpop.f32.mrf.mxu0  ;;  %v355_v53 = vpop.f32.mrf.mxu1 }
 0x214   :  { %v359_v49 = vmul.f32 %v335_v46, %v902_v52  ;;  %v361_v54 = vmul.f32 %v355_v53, %v913_v8 }
 0x216   :  { %v362_v51 = vpack.c.bf16 %v359_v49, %v358_v47  ;;  %v363_v56 = vpack.c.bf16 %v361_v54, %v360_v55 }
 0x218   :  { %721 = vmatmul.msk.bf16.vlgmr.msra.gmra.mxu1 %vm41_vm0, %v362_v51 }
 0x21b   :  { %v389_v57 = vpop.f32.mrf.mxu0 }
 0x223   :  { %v391_v59 = vpop.f32.mrf.mxu0 }
 0x228   :  { %722 = vmatmul.msk.bf16.gmra.mxu1 %vm41_vm0, %v363_v56 }
 0x22b   :  { %v394_v62 = vpop.f32.mrf.mxu0 }
 0x233   :  { %v396_v13 = vpop.f32.mrf.mxu0 }
 0x295   :  { %v420_v58 = vpop.f32.mrf.mxu1 }
 0x296   :  { %v421_v63 = vadd.f32 %v420_v58, %v389_v57 }
 0x298   :  { %v432_v4 = vadd.f32 %v753_v0, %v421_v63  ;;  %v487_v63 = vld [vmem:[#allocation2 + $0x4] sm:$0x1] }
 0x29a   :  { %v436_v11 = vmax.f32 %v432_v4, 0.0 }
 0x29c   :  { %v440_v17 = vsel %vm41_vm0, %v436_v11, 0.0 }
 0x29d   :  { %v422_v60 = vpop.f32.mrf.mxu1 }
 0x29e   :  { %v423_v61 = vadd.f32 %v422_v60, %v391_v59 }
 0x2a0   :  { %v433_v2 = vadd.f32 %v753_v0, %v423_v61 }
 0x2a2   :  { %v437_v9 = vmax.f32 %v433_v2, 0.0 }
 0x2a4   :  { %v441_v15 = vsel %vm41_vm0, %v437_v9, 0.0 }
 0x2a5   :  { %v425_v1 = vpop.f32.mrf.mxu1  ;;  %v442_v20 = vadd.f32 %v441_v15, %v440_v17 }
 0x2a6   :  { %v426_v3 = vadd.f32 %v425_v1, %v394_v62 }
 0x2a8   :  { %v434_v6 = vadd.f32 %v753_v0, %v426_v3  ;;  %v754_v3 = vld [vmem:[#allocation2 + $0x5] ss:$0 sm:$0xff] }
 0x2aa   :  { %v438_v12 = vmax.f32 %v434_v6, 0.0 }
 0x2ac   :  { %v443_v18 = vsel %vm41_vm0, %v438_v12, 0.0 }
 0x2ad   :  { %v427_v14 = vpop.f32.mrf.mxu1  ;;  %v444_v22 = vadd.f32 %v443_v18, %v442_v20 }
 0x2ae   :  { %v428_v16 = vadd.f32 %v427_v14, %v396_v13 }
 0x2b0   :  { %v435_v19 = vadd.f32 %v753_v0, %v428_v16 }
 0x2b2   :  { %v439_v21 = vmax.f32 %v435_v19, 0.0 }
 0x2b4   :  { %v445_v23 = vsel %vm41_vm0, %v439_v21, 0.0 }
 0x2b5   :  { %v446_v24 = vadd.f32 %v445_v23, %v444_v22 }
 0x2b7   :  { %v447_v25 = vrot.slane %v446_v24, 4 }
 0x2b9   :  { %v448_v26 = vadd.f32 %v447_v25, %v446_v24  ;;  %v744_v24 = vld [vmem:[%s981_s2 + $0x28] sm:$0xff] }
 0x2bb   :  { %v449_v27 = vrot.slane %v448_v26, 2 }
 0x2bd   :  { %v450_v28 = vadd.f32 %v449_v27, %v448_v26 }
 0x2bf   :  { %v451_v29 = vrot.slane %v450_v28, 1 }
 0x2c1   :  { %v452_v30 = vadd.f32 %v451_v29, %v450_v28 }
 0x2c3   :  { %v453_v31 = vmul.f32 0.03125, %v452_v30 }
 0x2c5   :  { %v454_v32 = vsub.f32 %v436_v11, %v453_v31  ;;  %v455_v33 = vsub.f32 %v437_v9, %v453_v31  ;;  %v456_v34 = vsub.f32 %v438_v12, %v453_v31  ;;  %v457_v35 = vsub.f32 %v439_v21, %v453_v31 }
 0x2c7   :  { %v458_v36 = vmul.f32 %v454_v32, %v454_v32  ;;  %v459_v37 = vmul.f32 %v455_v33, %v455_v33  ;;  %v460_v38 = vmul.f32 %v456_v34, %v456_v34  ;;  %v461_v39 = vmul.f32 %v457_v35, %v457_v35 }
 0x2c9   :  { %v462_v40 = vsel %vm41_vm0, %v458_v36, 0.0  ;;  %v463_v41 = vsel %vm41_vm0, %v459_v37, 0.0  ;;  %v465_v43 = vsel %vm41_vm0, %v460_v38, 0.0  ;;  %v467_v45 = vsel %vm41_vm0, %v461_v39, 0.0 }
 0x2ca   :  { %v464_v42 = vadd.f32 %v463_v41, %v462_v40  ;;  %v755_v41 = vld [vmem:[#allocation2 + $0x6] ss:$0 sm:$0xff] }
 0x2cc   :  { %v466_v44 = vadd.f32 %v465_v43, %v464_v42 }
 0x2ce   :  { %v468_v46 = vadd.f32 %v467_v45, %v466_v44 }
 0x2d0   :  { %v469_v47 = vrot.slane %v468_v46, 4 }
 0x2d2   :  { %v470_v49 = vadd.f32 %v469_v47, %v468_v46 }
 0x2d4   :  { %v471_v50 = vrot.slane %v470_v49, 2 }
 0x2d6   :  { %v472_v51 = vadd.f32 %v471_v50, %v470_v49 }
 0x2d8   :  { %v473_v53 = vrot.slane %v472_v51, 1 }
 0x2da   :  { %v474_v54 = vadd.f32 %v473_v53, %v472_v51 }
 0x2dc   :  { %v475_v55 = vmul.f32 0.03125, %v474_v54 }
 0x2de   :  { %v476_v56 = vadd.f32 1e-05, %v475_v55 }
 0x2e0   :  { %766 = vrsqrt.f32 %v476_v56  ;;  %vm483_vm8 = vweird.f32 %v476_v56 }
 0x2e6   :  { %v767_v57 = vpop.eup %766 }
 0x2e7   :  { %v478_v58 = vmul.f32 %v767_v57, %v476_v56  ;;  %vm484_vm7 = vweird.f32 %v767_v57 }
 0x2e8   :  { %vm485_vm9 = vmor %vm483_vm8, %vm484_vm7 }
 0x2e9   :  { %v479_v59 = vmul.f32 %v767_v57, %v478_v58 }
 0x2eb   :  { %v480_v60 = vmul.f32 0.5, %v479_v59 }
 0x2ed   :  { %v481_v61 = vsub.f32 1.5, %v480_v60 }
 0x2ef   :  { %v482_v62 = vmul.f32 %v767_v57, %v481_v61 }
 0x2f1   :  { %v486_v0 = vsel %vm485_vm9, %v767_v57, %v482_v62 }
 0x2f2   :  { %v488_v1 = vmul.f32 %v487_v63, %v486_v0 }
 0x2f4   :  { %v489_v2 = vperm.slane %v488_v1, 0 }
 0x2f6   :  { %v493_v4 = vmul.f32 %v489_v2, %v457_v35  ;;  %v492_v6 = vmul.f32 %v489_v2, %v456_v34  ;;  %v490_v9 = vmul.f32 %v489_v2, %v454_v32  ;;  %v491_v11 = vmul.f32 %v489_v2, %v455_v33 }
 0x2f8   :  { %v499_v12 = vadd.f32 %v754_v3, %v493_v4  ;;  %v498_v13 = vadd.f32 %v754_v3, %v492_v6  ;;  %v496_v14 = vadd.f32 %v754_v3, %v490_v9  ;;  %v497_v15 = vadd.f32 %v754_v3, %v491_v11 }
 0x2fa   :  { %636 = vrot.lane.b32.xlu1 %v499_v12, %s821_s11  ;;  %634 = vrot.lane.b32.xlu0 %v498_v13, %s821_s11  ;;  %v500_v16 = vpack.c.bf16 %v496_v14, %v496_v14  ;;  %v501_v17 = vpack.c.bf16 %v497_v15, %v497_v15  ;;  %v502_v18 = vpack.c.bf16 %v498_v13, %v498_v13 }
 0x2fb   :  { %630 = vrot.lane.b32.xlu2 %v496_v14, %s821_s11  ;;  %v503_v19 = vpack.c.bf16 %v499_v12, %v499_v12 }
 0x2fc   :  { %v506_v20 = vunpack.c.l.b16 %v500_v16  ;;  %v507_v21 = vunpack.c.l.b16 %v501_v17  ;;  %v526_v22 = vunpack.c.l.b16 %v502_v18 }
 0x2fd   :  { %v527_v23 = vunpack.c.l.b16 %v503_v19 }
 0x2fe   :  { %v508_v25 = vpack.c.b16 %v507_v21, %v506_v20 }
 0x2ff   :  { %v528_v26 = vpack.c.b16 %v527_v23, %v526_v22 }
 0x300   :  { %517 = vmatpush.bf16.msrb.mxu2 %v508_v25 }
 0x301   :  { %537 = vmatpush.bf16.msrb.mxu3 %v528_v26 }
 0x303   :  { %632 = vrot.lane.b32.xlu2 %v497_v15, %s821_s11  ;;  %723 = vmatmul.msk.bf16.vlgmr.msrb.gmra.mxu2 %vm41_vm0, %v866_v5  ;;  %v743_v5 = vld [vmem:[%s981_s2 + $0x20] sm:$0xff]  ;;  %s822_s2 = smov 32  }
 0x304   :  { %573 = vmatpush.bf16.msra.mxu2 %v744_v24  ;;  %724 = vmatmul.msk.bf16.vlgmr.msrb.gmra.mxu3 %vm41_vm0, %v874_v7 }
 0x305   :  { %604 = vmatpush.bf16.msra.mxu3 %v743_v5 }
 0x313   :  { %729 = vmatmul.msk.bf16.vlgmr.msra.gmra.mxu2 %vm41_vm0, %v508_v25 }
 0x323   :  { %730 = vmatmul.msk.bf16.gmra.mxu2 %vm41_vm0, %v528_v26 }
 0x355   :  { %v631_v27 = vpop.permute.xlu2 %630 }
 0x356   :  { %643 = vst.msk [vmem:[#allocation5] sm:$0xff] %vm642_vm10, %v631_v27 }
 0x35d   :  { %v633_v28 = vpop.permute.xlu2 %632 }
 0x35e   :  { %644 = vst.msk [vmem:[#allocation5 + $0x8] sm:$0xff] %vm642_vm10, %v633_v28 }
 0x36c   :  { %v637_v29 = vpop.permute.xlu1 %636  ;;  %v635_v30 = vpop.permute.xlu0 %634 }
 0x36d   :  { %646 = vst.msk [vmem:[#allocation5 + $0x18] sm:$0xff] %vm642_vm10, %v637_v29 }
 0x36e   :  { %645 = vst.msk [vmem:[#allocation5 + $0x10] sm:$0xff] %vm642_vm10, %v635_v30 }
 0x386   :  { %v519_v31 = vpop.f32.mrf.mxu2 }
 0x387   :  { %v544_v32 = vmul.f32 %v519_v31, %v900_v48  ;;  %v539_v34 = vpop.f32.mrf.mxu3 }
 0x388   :  { %v546_v38 = vmul.f32 %v539_v34, %v915_v10 }
 0x38e   :  { %v521_v7 = vpop.f32.mrf.mxu2 }
 0x38f   :  { %v545_v33 = vmul.f32 %v521_v7, %v902_v52  ;;  %v541_v36 = vpop.f32.mrf.mxu3 }
 0x390   :  { %v547_v37 = vmul.f32 %v541_v36, %v913_v8 }
 0x391   :  { %v548_v35 = vpack.c.bf16 %v545_v33, %v544_v32 }
 0x392   :  { %v549_v39 = vpack.c.bf16 %v547_v37, %v546_v38 }
 0x393   :  { %735 = vmatmul.msk.bf16.vlgmr.msra.gmra.mxu3 %vm41_vm0, %v548_v35 }
 0x396   :  { %v575_v40 = vpop.f32.mrf.mxu2 }
 0x39e   :  { %v577_v48 = vpop.f32.mrf.mxu2 }
 0x3a3   :  { %736 = vmatmul.msk.bf16.gmra.mxu3 %vm41_vm0, %v549_v39  ;;  %vm663_vm0 = vcmask 392448  }
 0x3a6   :  { %v580_v47 = vpop.f32.mrf.mxu2 }
 0x3ae   :  { %v582_v10 = vpop.f32.mrf.mxu2 }
 0x416   :  { %v606_v42 = vpop.f32.mrf.mxu3 }
 0x417   :  { %v607_v43 = vadd.f32 %v606_v42, %v575_v40 }
 0x419   :  { %v618_v44 = vadd.f32 %v755_v41, %v607_v43 }
 0x41b   :  { %651 = vrot.lane.b32.xlu2 %v618_v44, %s822_s2 }
 0x41e   :  { %v608_v52 = vpop.f32.mrf.mxu3 }
 0x41f   :  { %v609_v45 = vadd.f32 %v608_v52, %v577_v48 }
 0x421   :  { %v619_v46 = vadd.f32 %v755_v41, %v609_v45 }
 0x423   :  { %653 = vrot.lane.b32.xlu2 %v619_v46, %s822_s2 }
 0x426   :  { %v611_v49 = vpop.f32.mrf.mxu3 }
 0x427   :  { %v612_v8 = vadd.f32 %v611_v49, %v580_v47 }
 0x429   :  { %v620_v50 = vadd.f32 %v755_v41, %v612_v8 }
 0x42b   :  { %655 = vrot.lane.b32.xlu2 %v620_v50, %s822_s2 }
 0x42e   :  { %v613_v51 = vpop.f32.mrf.mxu3 }
 0x42f   :  { %v614_v53 = vadd.f32 %v613_v51, %v582_v10 }
 0x431   :  { %v621_v54 = vadd.f32 %v755_v41, %v614_v53 }
 0x433   :  { %657 = vrot.lane.b32.xlu0 %v621_v54, %s822_s2 }
 0x475   :  { %v652_v55 = vpop.permute.xlu2 %651 }
 0x476   :  { %664 = vst.msk [vmem:[#allocation5] sm:$0xff] %vm663_vm0, %v652_v55 }
 0x47d   :  { %v654_v56 = vpop.permute.xlu2 %653 }
 0x47e   :  { %665 = vst.msk [vmem:[#allocation5 + $0x8] sm:$0xff] %vm663_vm0, %v654_v56 }
 0x485   :  { %v656_v57 = vpop.permute.xlu2 %655 }
 0x486   :  { %666 = vst.msk [vmem:[#allocation5 + $0x10] sm:$0xff] %vm663_vm0, %v656_v57 }
 0x4a5   :  { %v658_v58 = vpop.permute.xlu0 %657 }
 0x4a6   :  { %667 = vst.msk [vmem:[#allocation5 + $0x18] sm:$0xff] %vm663_vm0, %v658_v58 }
 0x4a7   :  { %680 = dma.vmem_to_hbm [thread:$0]  %s673_s17, 512, %s675_s20, [#allocation4], %s824_s21, %s824_s21, %s825_s22  }
 0x4a8   :  { %818 = dma.done.wait [#allocation4], 512  }
 0x4a9   :  { %819 = vsyncadd [#allocation4], 4294966784 }
 0x4aa   :  { %685 = vsyncpa [#allocation3], 1 }
 0x4ab   :  { %686 = vsyncpa [#allocation4], 1 }

// kernel: _lambda_.2
= control target key start
LH: loop header
LB: loop body
LE: loop exit
PB: predicated region body
PF: predicated region fallthrough
CT: control target
= control target key end

     0   :  { %9 = vsyncpa [#allocation3], 0  ;;  %s1095_s0 = inlined_call_operand.vmem [shape: bf16[2,16,8], index: 0, kind: input, shape index: {}]   ;;  %s1096_s1 = inlined_call_operand.vmem [shape: bf16[2,16,16], index: 1, kind: input, shape index: {}]   ;;  %s1097_s2 = inlined_call_operand.hbm [shape: bf16[144,16], index: 2, kind: input, shape index: {}]   ;;  %s1098_s3 = inlined_call_operand.hbm [shape: f32[8,16], index: 3, kind: input, shape index: {}]   ;;  %s1099_s4 = inlined_call_operand.hbm [shape: f32[32,16], index: 4, kind: output, shape index: {}]  }
   0x1   :  { %10 = vsyncpa [#allocation6], 0 }
   0x2   :  { %11 = vsyncpa [#allocation4], 0  ;;  %s20_s17 = sshll.u32 %s1097_s2, 4  ;;  %s944_s18 = smov [#allocation2]   ;;  %s21_s17 = int_to_ptr.hbm [resolvable:$true] %s20_s17 }
   0x3   :  { %s22_s19 = sshll.u32 %s944_s18, 4  ;;  %s34_s22 = sshll.u32 %s1098_s3, 4  ;;  %s23_s19 = int_to_ptr.vmem [resolvable:$true] %s22_s19  ;;  %s35_s22 = int_to_ptr.hbm [resolvable:$true] %s34_s22 }
   0x4   :  { %s945_s23 = smov 64   ;;  %s946_s24 = smov 4  }
   0x5   :  { %28 = dma.hbm_to_vmem [thread:$0]  %s21_s17, 1152, %s23_s19, [#allocation3], %s945_s23, %s945_s23, %s946_s24  }
   0x6   :  { %s947_s25 = smov [#allocation5]  }
   0x7   :  { %s36_s26 = sshll.u32 %s947_s25, 4  ;;  %s37_s26 = int_to_ptr.vmem [resolvable:$true] %s36_s26 }
   0x8   :  { %39 = dma.hbm_to_vmem [thread:$0]  %s35_s22, 128, %s37_s26, [#allocation6]  }
   0x9   :  { %938 = dma.done.wait [#allocation3], 1152  }
   0xa   :  { %939 = vsyncadd [#allocation3], 4294966144 }
   0xb   :  { %940 = dma.done.wait [#allocation6], 128  }
   0xc   :  { %941 = vsyncadd [#allocation6], 4294967168  ;;  %v831_v0 = vld [vmem:[%s1095_s0] sm:$0xff]  ;;  %v51_v1 = vld [vmem:[%s1096_s1 + $0x8] sm:$0xff]   ;;  %vm57_vm0 = vcmask 130048   ;;  %vm209_vm1 = vcmask 1043456  }
   0xd   :  { %v49_v2 = vld [vmem:[%s1096_s1] sm:$0xff]   ;;  %v55_v3 = vunpack.c.l.bf16 %v51_v1  ;;  %v832_v6 = vld [vmem:[%s1095_s0 + $0x8] sm:$0xff]  ;;  %159 = vmatpush.bf16.msra.mxu0 %v831_v0  ;;  %v56_v10 = vunpack.c.h.bf16 %v51_v1  ;;  %vm202_vm2 = vcmask 64512   ;;  %s948_s0 = smov [#allocation7]   ;;  %s747_s13 = sshll.u32 %s1099_s4, 4  ;;  %s748_s13 = int_to_ptr.hbm [resolvable:$true] %s747_s13 }
   0xe   :  { %v53_v4 = vunpack.c.l.bf16 %v49_v2  ;;  %v994_v5 = vld [vmem:[%s1096_s1] sm:$0xff]  ;;  %v1002_v7 = vld [vmem:[%s1096_s1 + $0x8] sm:$0xff]  ;;  %187 = vmatpush.bf16.msra.mxu1 %v832_v6  ;;  %v54_v11 = vunpack.c.h.bf16 %v49_v2  ;;  %s745_s1 = sshll.u32 %s948_s0, 4  ;;  %s949_s14 = smov 128   ;;  %s746_s1 = int_to_ptr.vmem [resolvable:$true] %s745_s1 }
   0xf   :  { %v64_v8 = vsel %vm57_vm0, %v55_v3, 0.0  ;;  %v67_v12 = vsel %vm57_vm0, %v56_v10, 0.0  ;;  %v201_v14 = vld [vmem:[#allocation2 + $0x8] sm:$0xf]  ;;  %v200_v16 = vld [vmem:[#allocation2] sm:$0xf] }
  0x10   :  { %v58_v9 = vsel %vm57_vm0, %v53_v4, 0.0  ;;  %65 = vadd.xlane.f32.xlu1 %v64_v8  ;;  %769 = vmatmul.msk.bf16.vlgmr.msra.gmra.mxu0 %vm57_vm0, %v994_v5  ;;  %v61_v13 = vsel %vm57_vm0, %v54_v11, 0.0  ;;  %v211_v15 = vsel %vm209_vm1, %v201_v14, 0  ;;  %v239_v17 = vsel %vm209_vm1, %v200_v16, 0  ;;  %s950_s15 = smov 8  }
  0x11   :  { %59 = vadd.xlane.f32.xlu0 %v58_v9  ;;  %778 = vmatmul.msk.bf16.vlgmr.msra.gmra.mxu1 %vm57_vm0, %v1002_v7 }
  0x12   :  { %840 = vmatpush.bf16.msra.mxu3 %v211_v15  ;;  %220 = vmatpush.bf16.msra.mxu2 %v211_v15 }
  0x15   :  { %780 = vmatmul.msk.bf16.vlgmr.msra.gmra.mxu3 %vm202_vm2, %v832_v6  ;;  %779 = vmatmul.msk.bf16.vlgmr.msra.gmra.mxu2 %vm202_vm2, %v831_v0 }
  0x16   :  { %248 = vmatpush.bf16.msrb.mxu3 %v239_v17 }
  0x18   :  { %68 = vadd.xlane.f32.xlu1 %v67_v12 }
  0x19   :  { %62 = vadd.xlane.f32.xlu0 %v61_v13 }
  0x83   :  { %v66_v18 = vpop.xlane.xlu1 %65 }
  0x84   :  { %v60_v19 = vpop.xlane.xlu0 %59  ;;  %v1014_v23 = vmax.f32 %v66_v18, 1.0 }
  0x85   :  { %v70_v20 = vmax.f32 %v60_v19, 1.0 }
  0x86   :  { %vm109_vm13 = vweird.f32 %v1014_v23  ;;  %v115_v63 = vand.u32 2147483648, %v1014_v23  ;;  %v113_v1 = vand.u32 2147483647, %v1014_v23 }
  0x87   :  { %854 = vrcp.f32 %v70_v20  ;;  %v85_v36 = vand.u32 2147483648, %v70_v20  ;;  %vm79_vm4 = vweird.f32 %v70_v20  ;;  %v83_v39 = vand.u32 2147483647, %v70_v20 }
  0x88   :  { %v116_v4 = vor.u32 1.1754944e-38, %v115_v63 }
  0x89   :  { %v86_v45 = vor.u32 1.1754944e-38, %v85_v36  ;;  %vm84_vm7 = vcmp.eq.f32.partialorder %v83_v39, 8.507059e+37 }
  0x8b   :  { %v69_v21 = vpop.xlane.xlu1 %68 }
  0x8c   :  { %v63_v22 = vpop.xlane.xlu0 %62  ;;  %v1016_v24 = vmax.f32 %v69_v21, 1.0 }
  0x8d   :  { %v71_v25 = vmax.f32 %v63_v22, 1.0  ;;  %v855_v26 = vpop.eup %854  ;;  %v161_v32 = vpop.f32.mrf.mxu0  ;;  %v848_v22 = vld [vmem:[#allocation5] ss:$0 sm:$0xff] }
  0x8e   :  { %v75_v27 = vmul.f32 %v855_v26, %v70_v20  ;;  %856 = vrcp.f32 %v1016_v24  ;;  %vm80_vm3 = vweird.f32 %v855_v26  ;;  %v189_v57 = vpop.f32.mrf.mxu1  ;;  %vm124_vm11 = vweird.f32 %v1016_v24 }
  0x8f   :  { %858 = vrcp.f32 %v71_v25  ;;  %vm81_vm5 = vmor %vm79_vm4, %vm80_vm3  ;;  %v100_v41 = vand.u32 2147483648, %v71_v25  ;;  %v98_v44 = vand.u32 2147483647, %v71_v25  ;;  %vm94_vm8 = vweird.f32 %v71_v25 }
  0x90   :  { %860 = vrcp.f32 %v1014_v23  ;;  %v76_v28 = vsub.f32 1.0, %v75_v27  ;;  %v130_v60 = vand.u32 2147483648, %v1016_v24  ;;  %v128_v62 = vand.u32 2147483647, %v1016_v24 }
  0x91   :  { %v101_v49 = vor.u32 1.1754944e-38, %v100_v41  ;;  %vm99_vm10 = vcmp.eq.f32.partialorder %v98_v44, 8.507059e+37  ;;  %vm114_vm4 = vcmp.eq.f32.partialorder %v113_v1, 8.507059e+37 }
  0x92   :  { %v77_v29 = vmul.f32 %v855_v26, %v76_v28  ;;  %v131_v2 = vor.u32 1.1754944e-38, %v130_v60  ;;  %vm129_vm3 = vcmp.eq.f32.partialorder %v128_v62, 8.507059e+37 }
  0x94   :  { %v857_v30 = vpop.eup %856  ;;  %v78_v35 = vadd.f32 %v855_v26, %v77_v29 }
  0x95   :  { %v859_v31 = vpop.eup %858  ;;  %v120_v37 = vmul.f32 %v857_v30, %v1016_v24  ;;  %v163_v53 = vpop.f32.mrf.mxu0  ;;  %vm125_vm12 = vweird.f32 %v857_v30 }
  0x96   :  { %v861_v33 = vpop.eup %860  ;;  %v90_v34 = vmul.f32 %v859_v31, %v71_v25  ;;  %v82_v42 = vsel %vm81_vm5, %v855_v26, %v78_v35  ;;  %vm95_vm6 = vweird.f32 %v859_v31  ;;  %vm126_vm15 = vmor %vm124_vm11, %vm125_vm12  ;;  %v191_v9 = vpop.f32.mrf.mxu1 }
  0x97   :  { %v105_v40 = vmul.f32 %v861_v33, %v1014_v23  ;;  %v121_v46 = vsub.f32 1.0, %v120_v37  ;;  %v1022_v48 = vsel %vm84_vm7, %v86_v45, %v82_v42  ;;  %vm96_vm9 = vmor %vm94_vm8, %vm95_vm6  ;;  %vm110_vm14 = vweird.f32 %v861_v33 }
  0x98   :  { %v91_v38 = vsub.f32 1.0, %v90_v34  ;;  %v194_v54 = vmul.f32 %v161_v32, %v1022_v48  ;;  %vm111_vm1 = vmor %vm109_vm13, %vm110_vm14  ;;  %v227_v14 = vpop.f32.mrf.mxu3  ;;  %v222_v16 = vpop.f32.mrf.mxu2 }
  0x99   :  { %v106_v50 = vsub.f32 1.0, %v105_v40  ;;  %v122_v56 = vmul.f32 %v857_v30, %v121_v46 }
  0x9a   :  { %v92_v43 = vmul.f32 %v859_v31, %v91_v38 }
  0x9b   :  { %v107_v58 = vmul.f32 %v861_v33, %v106_v50  ;;  %v123_v61 = vadd.f32 %v857_v30, %v122_v56 }
  0x9c   :  { %v93_v47 = vadd.f32 %v859_v31, %v92_v43 }
  0x9d   :  { %v108_v0 = vadd.f32 %v861_v33, %v107_v58  ;;  %v127_v3 = vsel %vm126_vm15, %v857_v30, %v123_v61 }
  0x9e   :  { %v97_v51 = vsel %vm96_vm9, %v859_v31, %v93_v47  ;;  %v1035_v8 = vsel %vm129_vm3, %v131_v2, %v127_v3 }
  0x9f   :  { %v1024_v52 = vsel %vm99_vm10, %v101_v49, %v97_v51  ;;  %v112_v6 = vsel %vm111_vm1, %v861_v33, %v108_v0  ;;  %v197_v11 = vmul.f32 %v191_v9, %v1035_v8 }
  0xa0   :  { %v195_v55 = vmul.f32 %v163_v53, %v1024_v52  ;;  %v1037_v10 = vsel %vm114_vm4, %v116_v4, %v112_v6  ;;  %v229_v15 = vpop.f32.mrf.mxu3  ;;  %v224_v19 = vpop.f32.mrf.mxu2 }
  0xa1   :  { %v196_v12 = vmul.f32 %v189_v57, %v1037_v10 }
  0xa2   :  { %v198_v59 = vpack.c.bf16 %v195_v55, %v194_v54 }
  0xa3   :  { %v199_v13 = vpack.c.bf16 %v197_v11, %v196_v12 }
  0xa4   :  { %781 = vmatmul.msk.bf16.vlgmr.msrb.gmra.mxu3 %vm202_vm2, %v198_v59 }
  0xb4   :  { %782 = vmatmul.msk.bf16.gmra.mxu3 %vm202_vm2, %v199_v13 }
 0x127   :  { %v250_v17 = vpop.f32.mrf.mxu3 }
 0x128   :  { %v251_v21 = vadd.f32 %v250_v17, %v222_v16 }
 0x12a   :  { %v262_v26 = vadd.f32 %v848_v22, %v251_v21 }
 0x12c   :  { %v266_v29 = vmax.f32 %v262_v26, 0.0 }
 0x12e   :  { %v270_v34 = vsel %vm57_vm0, %v266_v29, 0.0 }
 0x12f   :  { %v252_v18 = vpop.f32.mrf.mxu3 }
 0x130   :  { %v253_v20 = vadd.f32 %v252_v18, %v224_v19 }
 0x132   :  { %v263_v24 = vadd.f32 %v848_v22, %v253_v20  ;;  %v317_v20 = vld [vmem:[#allocation5 + $0x1] sm:$0x1] }
 0x134   :  { %v267_v28 = vmax.f32 %v263_v24, 0.0  ;;  %v849_v24 = vld [vmem:[#allocation5 + $0x2] ss:$0 sm:$0xff] }
 0x136   :  { %v271_v32 = vsel %vm57_vm0, %v267_v28, 0.0 }
 0x137   :  { %v255_v23 = vpop.f32.mrf.mxu3  ;;  %v272_v37 = vadd.f32 %v271_v32, %v270_v34 }
 0x138   :  { %v256_v25 = vadd.f32 %v255_v23, %v227_v14 }
 0x13a   :  { %v264_v27 = vadd.f32 %v848_v22, %v256_v25 }
 0x13c   :  { %v268_v30 = vmax.f32 %v264_v27, 0.0 }
 0x13e   :  { %v273_v35 = vsel %vm57_vm0, %v268_v30, 0.0 }
 0x13f   :  { %v257_v31 = vpop.f32.mrf.mxu3  ;;  %v274_v39 = vadd.f32 %v273_v35, %v272_v37 }
 0x140   :  { %v258_v33 = vadd.f32 %v257_v31, %v229_v15 }
 0x142   :  { %v265_v36 = vadd.f32 %v848_v22, %v258_v33 }
 0x144   :  { %v269_v38 = vmax.f32 %v265_v36, 0.0 }
 0x146   :  { %v275_v40 = vsel %vm57_vm0, %v269_v38, 0.0 }
 0x147   :  { %v276_v41 = vadd.f32 %v275_v40, %v274_v39 }
 0x149   :  { %v277_v42 = vrot.slane %v276_v41, 4 }
 0x14b   :  { %v278_v43 = vadd.f32 %v277_v42, %v276_v41  ;;  %v834_v41 = vld [vmem:[#allocation2 + $0x18] sm:$0xff] }
 0x14d   :  { %v279_v44 = vrot.slane %v278_v43, 2 }
 0x14f   :  { %v280_v45 = vadd.f32 %v279_v44, %v278_v43  ;;  %v833_v44 = vld [vmem:[#allocation2 + $0x10] sm:$0xff] }
 0x151   :  { %v281_v46 = vrot.slane %v280_v45, 1 }
 0x153   :  { %v282_v47 = vadd.f32 %v281_v46, %v280_v45 }
 0x155   :  { %v283_v49 = vmul.f32 0.03125, %v282_v47  ;;  %v837_v47 = vld [vmem:[#allocation2 + $0x30] sm:$0xff] }
 0x157   :  { %v284_v50 = vsub.f32 %v266_v29, %v283_v49  ;;  %v285_v51 = vsub.f32 %v267_v28, %v283_v49  ;;  %v286_v53 = vsub.f32 %v268_v30, %v283_v49  ;;  %v287_v54 = vsub.f32 %v269_v38, %v283_v49 }
 0x159   :  { %v288_v55 = vmul.f32 %v284_v50, %v284_v50  ;;  %v289_v56 = vmul.f32 %v285_v51, %v285_v51  ;;  %v290_v57 = vmul.f32 %v286_v53, %v286_v53  ;;  %v291_v58 = vmul.f32 %v287_v54, %v287_v54 }
 0x15b   :  { %v292_v59 = vsel %vm57_vm0, %v288_v55, 0.0  ;;  %v293_v60 = vsel %vm57_vm0, %v289_v56, 0.0  ;;  %v295_v62 = vsel %vm57_vm0, %v290_v57, 0.0  ;;  %v297_v0 = vsel %vm57_vm0, %v291_v58, 0.0 }
 0x15c   :  { %v294_v61 = vadd.f32 %v293_v60, %v292_v59 }
 0x15e   :  { %v296_v63 = vadd.f32 %v295_v62, %v294_v61 }
 0x160   :  { %v298_v1 = vadd.f32 %v297_v0, %v296_v63 }
 0x162   :  { %v299_v2 = vrot.slane %v298_v1, 4 }
 0x164   :  { %v300_v3 = vadd.f32 %v299_v2, %v298_v1  ;;  %v850_v1 = vld [vmem:[#allocation5 + $0x3] ss:$0 sm:$0xff] }
 0x166   :  { %v301_v4 = vrot.slane %v300_v3, 2 }
 0x168   :  { %v302_v6 = vadd.f32 %v301_v4, %v300_v3 }
 0x16a   :  { %v303_v9 = vrot.slane %v302_v6, 1 }
 0x16c   :  { %v304_v11 = vadd.f32 %v303_v9, %v302_v6 }
 0x16e   :  { %v305_v12 = vmul.f32 0.03125, %v304_v11 }
 0x170   :  { %v306_v13 = vadd.f32 1e-05, %v305_v12 }
 0x172   :  { %862 = vrsqrt.f32 %v306_v13  ;;  %vm313_vm5 = vweird.f32 %v306_v13 }
 0x178   :  { %v863_v14 = vpop.eup %862 }
 0x179   :  { %v308_v15 = vmul.f32 %v863_v14, %v306_v13  ;;  %vm314_vm2 = vweird.f32 %v863_v14 }
 0x17a   :  { %vm315_vm6 = vmor %vm313_vm5, %vm314_vm2 }
 0x17b   :  { %v309_v16 = vmul.f32 %v863_v14, %v308_v15 }
 0x17d   :  { %v310_v17 = vmul.f32 0.5, %v309_v16 }
 0x17f   :  { %v311_v18 = vsub.f32 1.5, %v310_v17 }
 0x181   :  { %v312_v19 = vmul.f32 %v863_v14, %v311_v18 }
 0x183   :  { %v316_v21 = vsel %vm315_vm6, %v863_v14, %v312_v19 }
 0x184   :  { %v318_v22 = vmul.f32 %v317_v20, %v316_v21 }
 0x186   :  { %v319_v23 = vperm.slane %v318_v22, 0 }
 0x188   :  { %v323_v25 = vmul.f32 %v319_v23, %v287_v54  ;;  %v320_v26 = vmul.f32 %v319_v23, %v284_v50  ;;  %v321_v27 = vmul.f32 %v319_v23, %v285_v51  ;;  %v322_v28 = vmul.f32 %v319_v23, %v286_v53 }
 0x18a   :  { %v326_v29 = vadd.f32 %v849_v24, %v320_v26  ;;  %v327_v30 = vadd.f32 %v849_v24, %v321_v27  ;;  %v328_v31 = vadd.f32 %v849_v24, %v322_v28  ;;  %v329_v32 = vadd.f32 %v849_v24, %v323_v25 }
 0x18c   :  { %v330_v33 = vpack.c.bf16 %v326_v29, %v326_v29  ;;  %v331_v34 = vpack.c.bf16 %v327_v30, %v327_v30  ;;  %v332_v35 = vpack.c.bf16 %v328_v31, %v328_v31  ;;  %v333_v36 = vpack.c.bf16 %v329_v32, %v329_v32 }
 0x18e   :  { %v336_v37 = vunpack.c.l.b16 %v330_v33  ;;  %v337_v38 = vunpack.c.l.b16 %v331_v34  ;;  %v356_v39 = vunpack.c.l.b16 %v332_v35  ;;  %v357_v40 = vunpack.c.l.b16 %v333_v36 }
 0x190   :  { %v338_v42 = vpack.c.b16 %v337_v38, %v336_v37  ;;  %v358_v43 = vpack.c.b16 %v357_v40, %v356_v39 }
 0x192   :  { %347 = vmatpush.bf16.msrb.mxu0 %v338_v42  ;;  %367 = vmatpush.bf16.msrb.mxu1 %v358_v43 }
 0x195   :  { %783 = vmatmul.msk.bf16.vlgmr.msrb.gmra.mxu0 %vm57_vm0, %v994_v5  ;;  %784 = vmatmul.msk.bf16.vlgmr.msrb.gmra.mxu1 %vm57_vm0, %v1002_v7 }
 0x196   :  { %403 = vmatpush.bf16.msra.mxu0 %v834_v41  ;;  %434 = vmatpush.bf16.msra.mxu1 %v833_v44 }
 0x19a   :  { %680 = vmatpush.bf16.msrb.mxu1 %v837_v47 }
 0x1a5   :  { %789 = vmatmul.msk.bf16.vlgmr.msra.gmra.mxu0 %vm57_vm0, %v338_v42 }
 0x1b5   :  { %790 = vmatmul.msk.bf16.gmra.mxu0 %vm57_vm0, %v358_v43 }
 0x212   :  { %v349_v45 = vpop.f32.mrf.mxu0  ;;  %v369_v51 = vpop.f32.mrf.mxu1 }
 0x213   :  { %v374_v49 = vmul.f32 %v349_v45, %v1022_v48  ;;  %v376_v56 = vmul.f32 %v369_v51, %v1037_v10 }
 0x21a   :  { %v351_v46 = vpop.f32.mrf.mxu0  ;;  %v371_v54 = vpop.f32.mrf.mxu1 }
 0x21b   :  { %v375_v50 = vmul.f32 %v351_v46, %v1024_v52  ;;  %v377_v55 = vmul.f32 %v371_v54, %v1035_v8 }
 0x21d   :  { %v378_v53 = vpack.c.bf16 %v375_v50, %v374_v49  ;;  %v379_v57 = vpack.c.bf16 %v377_v55, %v376_v56  ;;  %v838_v56 = vld [vmem:[#allocation2 + $0x38] sm:$0xff] }
 0x21e   :  { %655 = vmatpush.bf16.msrb.mxu0 %v838_v56 }
 0x21f   :  { %795 = vmatmul.msk.bf16.vlgmr.msra.gmra.mxu1 %vm57_vm0, %v378_v53 }
 0x222   :  { %v405_v58 = vpop.f32.mrf.mxu0 }
 0x22a   :  { %v407_v60 = vpop.f32.mrf.mxu0 }
 0x22f   :  { %796 = vmatmul.msk.bf16.gmra.mxu1 %vm57_vm0, %v379_v57 }
 0x232   :  { %v410_v63 = vpop.f32.mrf.mxu0 }
 0x23a   :  { %v412_v14 = vpop.f32.mrf.mxu0 }
 0x23f   :  { %821 = vmatmul.msk.bf16.vlgmr.msrb.gmra.mxu1 %vm57_vm0, %v338_v42 }
 0x24f   :  { %822 = vmatmul.msk.bf16.gmra.mxu1 %vm57_vm0, %v358_v43 }
 0x29c   :  { %v436_v59 = vpop.f32.mrf.mxu1 }
 0x29d   :  { %v437_v0 = vadd.f32 %v436_v59, %v405_v58 }
 0x29f   :  { %v448_v6 = vadd.f32 %v850_v1, %v437_v0 }
 0x2a1   :  { %v452_v12 = vmax.f32 %v448_v6, 0.0  ;;  %v851_v6 = vld [vmem:[#allocation5 + $0x5] ss:$0 sm:$0xff] }
 0x2a3   :  { %v456_v18 = vsel %vm57_vm0, %v452_v12, 0.0 }
 0x2a4   :  { %v438_v61 = vpop.f32.mrf.mxu1 }
 0x2a5   :  { %v439_v62 = vadd.f32 %v438_v61, %v407_v60 }
 0x2a7   :  { %v449_v3 = vadd.f32 %v850_v1, %v439_v62 }
 0x2a9   :  { %v453_v11 = vmax.f32 %v449_v3, 0.0 }
 0x2ab   :  { %v457_v16 = vsel %vm57_vm0, %v453_v11, 0.0 }
 0x2ac   :  { %v441_v2 = vpop.f32.mrf.mxu1  ;;  %v458_v21 = vadd.f32 %v457_v16, %v456_v18 }
 0x2ad   :  { %v442_v4 = vadd.f32 %v441_v2, %v410_v63 }
 0x2af   :  { %v450_v9 = vadd.f32 %v850_v1, %v442_v4 }
 0x2b1   :  { %v454_v13 = vmax.f32 %v450_v9, 0.0 }
 0x2b3   :  { %v459_v19 = vsel %vm57_vm0, %v454_v13, 0.0 }
 0x2b4   :  { %v443_v15 = vpop.f32.mrf.mxu1  ;;  %v460_v23 = vadd.f32 %v459_v19, %v458_v21 }
 0x2b5   :  { %v444_v17 = vadd.f32 %v443_v15, %v412_v14 }
 0x2b7   :  { %v451_v20 = vadd.f32 %v850_v1, %v444_v17  ;;  %v503_v1 = vld [vmem:[#allocation5 + $0x4] sm:$0x1] }
 0x2b9   :  { %v455_v22 = vmax.f32 %v451_v20, 0.0 }
 0x2bb   :  { %v461_v24 = vsel %vm57_vm0, %v455_v22, 0.0 }
 0x2bc   :  { %v462_v25 = vadd.f32 %v461_v24, %v460_v23 }
 0x2be   :  { %v463_v26 = vrot.slane %v462_v25, 4 }
 0x2c0   :  { %v464_v27 = vadd.f32 %v463_v26, %v462_v25  ;;  %v836_v26 = vld [vmem:[#allocation2 + $0x28] sm:$0xff] }
 0x2c2   :  { %v465_v28 = vrot.slane %v464_v27, 2 }
 0x2c4   :  { %v466_v29 = vadd.f32 %v465_v28, %v464_v27 }
 0x2c6   :  { %v467_v30 = vrot.slane %v466_v29, 1 }
 0x2c8   :  { %v468_v31 = vadd.f32 %v467_v30, %v466_v29  ;;  %v835_v29 = vld [vmem:[#allocation2 + $0x20] sm:$0xff] }
 0x2ca   :  { %v469_v32 = vmul.f32 0.03125, %v468_v31 }
 0x2cc   :  { %v470_v33 = vsub.f32 %v452_v12, %v469_v32  ;;  %v471_v34 = vsub.f32 %v453_v11, %v469_v32  ;;  %v472_v35 = vsub.f32 %v454_v13, %v469_v32  ;;  %v473_v36 = vsub.f32 %v455_v22, %v469_v32  ;;  %v839_v32 = vld [vmem:[#allocation2 + $0x40] sm:$0xff] }
 0x2ce   :  { %v474_v37 = vmul.f32 %v470_v33, %v470_v33  ;;  %v475_v38 = vmul.f32 %v471_v34, %v471_v34  ;;  %v476_v39 = vmul.f32 %v472_v35, %v472_v35  ;;  %v477_v40 = vmul.f32 %v473_v36, %v473_v36 }
 0x2d0   :  { %v478_v41 = vsel %vm57_vm0, %v474_v37, 0.0  ;;  %v479_v42 = vsel %vm57_vm0, %v475_v38, 0.0  ;;  %v481_v44 = vsel %vm57_vm0, %v476_v39, 0.0  ;;  %v483_v46 = vsel %vm57_vm0, %v477_v40, 0.0 }
 0x2d1   :  { %v480_v43 = vadd.f32 %v479_v42, %v478_v41 }
 0x2d3   :  { %v482_v45 = vadd.f32 %v481_v44, %v480_v43 }
 0x2d5   :  { %v484_v47 = vadd.f32 %v483_v46, %v482_v45 }
 0x2d7   :  { %v485_v49 = vrot.slane %v484_v47, 4 }
 0x2d9   :  { %v486_v50 = vadd.f32 %v485_v49, %v484_v47 }
 0x2db   :  { %v487_v51 = vrot.slane %v486_v50, 2 }
 0x2dd   :  { %v488_v53 = vadd.f32 %v487_v51, %v486_v50 }
 0x2df   :  { %v489_v54 = vrot.slane %v488_v53, 1 }
 0x2e1   :  { %v490_v55 = vadd.f32 %v489_v54, %v488_v53 }
 0x2e3   :  { %v491_v57 = vmul.f32 0.03125, %v490_v55 }
 0x2e5   :  { %v492_v58 = vadd.f32 1e-05, %v491_v57  ;;  %v682_v57 = vpop.f32.mrf.mxu1 }
 0x2e7   :  { %864 = vrsqrt.f32 %v492_v58  ;;  %vm499_vm8 = vweird.f32 %v492_v58 }
 0x2ed   :  { %v865_v59 = vpop.eup %864 }
 0x2ee   :  { %v494_v60 = vmul.f32 %v865_v59, %v492_v58  ;;  %vm500_vm7 = vweird.f32 %v865_v59 }
 0x2ef   :  { %vm501_vm9 = vmor %vm499_vm8, %vm500_vm7 }
 0x2f0   :  { %v495_v61 = vmul.f32 %v865_v59, %v494_v60 }
 0x2f2   :  { %v496_v62 = vmul.f32 0.5, %v495_v61 }
 0x2f4   :  { %v497_v63 = vsub.f32 1.5, %v496_v62 }
 0x2f6   :  { %v498_v0 = vmul.f32 %v865_v59, %v497_v63  ;;  %v684_v63 = vpop.f32.mrf.mxu1 }
 0x2f8   :  { %v502_v2 = vsel %vm501_vm9, %v865_v59, %v498_v0  ;;  %v853_v59 = vld [vmem:[#allocation5 + $0x7] ss:$0 sm:$0xff] }
 0x2f9   :  { %v504_v3 = vmul.f32 %v503_v1, %v502_v2 }
 0x2fb   :  { %v505_v4 = vperm.slane %v504_v3, 0 }
 0x2fd   :  { %v509_v9 = vmul.f32 %v505_v4, %v473_v36  ;;  %v506_v11 = vmul.f32 %v505_v4, %v470_v33  ;;  %v507_v12 = vmul.f32 %v505_v4, %v471_v34  ;;  %v508_v13 = vmul.f32 %v505_v4, %v472_v35 }
 0x2ff   :  { %v515_v14 = vadd.f32 %v851_v6, %v509_v9  ;;  %v512_v15 = vadd.f32 %v851_v6, %v506_v11  ;;  %v513_v16 = vadd.f32 %v851_v6, %v507_v12  ;;  %v514_v17 = vadd.f32 %v851_v6, %v508_v13  ;;  %v687_v9 = vpop.f32.mrf.mxu1 }
 0x301   :  { %v519_v18 = vpack.c.bf16 %v515_v14, %v515_v14  ;;  %v516_v19 = vpack.c.bf16 %v512_v15, %v512_v15  ;;  %v517_v20 = vpack.c.bf16 %v513_v16, %v513_v16  ;;  %v518_v21 = vpack.c.bf16 %v514_v17, %v514_v17 }
 0x303   :  { %v522_v22 = vunpack.c.l.b16 %v516_v19  ;;  %v523_v23 = vunpack.c.l.b16 %v517_v20  ;;  %v542_v24 = vunpack.c.l.b16 %v518_v21  ;;  %v543_v25 = vunpack.c.l.b16 %v519_v18 }
 0x305   :  { %v524_v27 = vpack.c.b16 %v523_v23, %v522_v22  ;;  %v544_v28 = vpack.c.b16 %v543_v25, %v542_v24 }
 0x307   :  { %533 = vmatpush.bf16.msrb.mxu2 %v524_v27  ;;  %553 = vmatpush.bf16.msra.mxu3 %v544_v28  ;;  %v689_v16 = vpop.f32.mrf.mxu1 }
 0x308   :  { %815 = vmatmul.msk.bf16.vlgmr.msrb.gmra.mxu0 %vm57_vm0, %v524_v27 }
 0x30a   :  { %797 = vmatmul.msk.bf16.vlgmr.msrb.gmra.mxu2 %vm57_vm0, %v994_v5  ;;  %798 = vmatmul.msk.bf16.vlgmr.msra.gmra.mxu3 %vm57_vm0, %v1002_v7 }
 0x30b   :  { %589 = vmatpush.bf16.msra.mxu2 %v836_v26  ;;  %620 = vmatpush.bf16.msrb.mxu3 %v835_v29 }
 0x30f   :  { %715 = vmatpush.bf16.msrb.mxu2 %v839_v32 }
 0x318   :  { %816 = vmatmul.msk.bf16.gmra.mxu0 %vm57_vm0, %v544_v28 }
 0x31a   :  { %803 = vmatmul.msk.bf16.vlgmr.msra.gmra.mxu2 %vm57_vm0, %v524_v27 }
 0x32a   :  { %804 = vmatmul.msk.bf16.gmra.mxu2 %vm57_vm0, %v544_v28 }
 0x385   :  { %v657_v56 = vpop.f32.mrf.mxu0 }
 0x386   :  { %v683_v58 = vadd.f32 %v682_v57, %v657_v56 }
 0x38d   :  { %v535_v30 = vpop.f32.mrf.mxu2  ;;  %v555_v35 = vpop.f32.mrf.mxu3 }
 0x38e   :  { %v560_v33 = vmul.f32 %v535_v30, %v1022_v48  ;;  %v562_v37 = vmul.f32 %v555_v35, %v1037_v10  ;;  %v852_v48 = vld [vmem:[#allocation5 + $0x6] ss:$0 sm:$0xff]  ;;  %v659_v60 = vpop.f32.mrf.mxu0 }
 0x38f   :  { %v685_v1 = vadd.f32 %v684_v63, %v659_v60 }
 0x395   :  { %v537_v31 = vpop.f32.mrf.mxu2  ;;  %v557_v7 = vpop.f32.mrf.mxu3 }
 0x396   :  { %v561_v34 = vmul.f32 %v537_v31, %v1024_v52  ;;  %v563_v36 = vmul.f32 %v557_v7, %v1035_v8  ;;  %v662_v4 = vpop.f32.mrf.mxu0 }
 0x397   :  { %v688_v11 = vadd.f32 %v687_v9, %v662_v4 }
 0x398   :  { %v564_v5 = vpack.c.bf16 %v561_v34, %v560_v33  ;;  %v565_v38 = vpack.c.bf16 %v563_v36, %v562_v37 }
 0x39a   :  { %809 = vmatmul.msk.bf16.vlgmr.msrb.gmra.mxu3 %vm57_vm0, %v564_v5 }
 0x39d   :  { %v591_v39 = vpop.f32.mrf.mxu2 }
 0x39e   :  { %v664_v15 = vpop.f32.mrf.mxu0 }
 0x39f   :  { %v690_v17 = vadd.f32 %v689_v16, %v664_v15 }
 0x3a5   :  { %v593_v41 = vpop.f32.mrf.mxu2 }
 0x3aa   :  { %810 = vmatmul.msk.bf16.gmra.mxu3 %vm57_vm0, %v565_v38 }
 0x3ad   :  { %v596_v47 = vpop.f32.mrf.mxu2 }
 0x3b5   :  { %v598_v50 = vpop.f32.mrf.mxu2 }
 0x41d   :  { %v622_v40 = vpop.f32.mrf.mxu3 }
 0x41e   :  { %v623_v42 = vadd.f32 %v622_v40, %v591_v39 }
 0x420   :  { %v634_v44 = vadd.f32 %v852_v48, %v623_v42 }
 0x425   :  { %v624_v43 = vpop.f32.mrf.mxu3 }
 0x426   :  { %v625_v52 = vadd.f32 %v624_v43, %v593_v41 }
 0x428   :  { %v635_v45 = vadd.f32 %v852_v48, %v625_v52 }
 0x42a   :  { %v692_v46 = vpack.c.bf16 %v635_v45, %v634_v44 }
 0x42c   :  { %827 = vmatmul.msk.bf16.vlgmr.msrb.gmra.mxu2 %vm57_vm0, %v692_v46 }
 0x42d   :  { %v627_v49 = vpop.f32.mrf.mxu3 }
 0x42e   :  { %v628_v8 = vadd.f32 %v627_v49, %v596_v47 }
 0x430   :  { %v636_v53 = vadd.f32 %v852_v48, %v628_v8 }
 0x435   :  { %v629_v10 = vpop.f32.mrf.mxu3 }
 0x436   :  { %v630_v51 = vadd.f32 %v629_v10, %v598_v50 }
 0x438   :  { %v637_v54 = vadd.f32 %v852_v48, %v630_v51 }
 0x43a   :  { %v693_v55 = vpack.c.bf16 %v637_v54, %v636_v53 }
 0x43c   :  { %828 = vmatmul.msk.bf16.gmra.mxu2 %vm57_vm0, %v693_v55 }
 0x4af   :  { %v717_v61 = vpop.f32.mrf.mxu2 }
 0x4b0   :  { %v727_v62 = vadd.f32 %v717_v61, %v683_v58 }
 0x4b2   :  { %v733_v0 = vadd.f32 %v853_v59, %v727_v62 }
 0x4b4   :  { %737 = vst.msk [vmem:[#allocation7] sm:$0xff] %vm57_vm0, %v733_v0 }
 0x4b7   :  { %v719_v2 = vpop.f32.mrf.mxu2 }
 0x4b8   :  { %v728_v3 = vadd.f32 %v719_v2, %v685_v1 }
 0x4ba   :  { %v734_v6 = vadd.f32 %v853_v59, %v728_v3 }
 0x4bc   :  { %738 = vst.msk [vmem:[#allocation7 + $0x8] sm:$0xff] %vm57_vm0, %v734_v6 }
 0x4bf   :  { %v722_v12 = vpop.f32.mrf.mxu2 }
 0x4c0   :  { %v729_v13 = vadd.f32 %v722_v12, %v688_v11 }
 0x4c2   :  { %v735_v14 = vadd.f32 %v853_v59, %v729_v13 }
 0x4c4   :  { %739 = vst.msk [vmem:[#allocation7 + $0x10] sm:$0xff] %vm57_vm0, %v735_v14 }
 0x4c7   :  { %v724_v18 = vpop.f32.mrf.mxu2 }
 0x4c8   :  { %v730_v19 = vadd.f32 %v724_v18, %v690_v17 }
 0x4ca   :  { %v736_v20 = vadd.f32 %v853_v59, %v730_v19 }
 0x4cc   :  { %740 = vst.msk [vmem:[#allocation7 + $0x18] sm:$0xff] %vm57_vm0, %v736_v20 }
 0x4cd   :  { %753 = dma.vmem_to_hbm [thread:$0]  %s746_s1, 512, %s748_s13, [#allocation4], %s949_s14, %s949_s14, %s950_s15  }
 0x4ce   :  { %942 = dma.done.wait [#allocation4], 512  }
 0x4cf   :  { %943 = vsyncadd [#allocation4], 4294966784 }
 0x4d0   :  { %758 = vsyncpa [#allocation3], 1 }
 0x4d1   :  { %759 = vsyncpa [#allocation6], 1 }
 0x4d2   :  { %760 = vsyncpa [#allocation4], 1 }

</bundles_post_ra>
